<compile_context>
chip_gen: v6e
topology: v6e:2x2x1
jax: 0.10.0
libtpu: 0.0.40
codegen_flags: <defaults>
</compile_context>

<pallas_src>
import math
import functools

import jax
import jax.numpy as jnp
from jax import lax
from jax.experimental import pallas as pl
from jax.experimental.pallas import tpu as pltpu


# MXU operands: bf16 is native on v5e/v6e/v7x MXUs (f32 is emulated).
# All accumulation / softmax / LayerNorm math stays f32 (v5e EUP/VPU has no bf16).
MATMUL_DTYPE = jnp.bfloat16
NEG_INF = -1e9

_VMEM_LIMIT = None


def _vmem_limit_bytes():
    """32 MiB scoped limit (safe on v7x's 64 MiB VMEM); 64 MiB on v5e/v6e (128 MiB)."""
    global _VMEM_LIMIT
    if _VMEM_LIMIT is None:
        limit = 32 * 1024 * 1024
        try:
            if pltpu.get_tpu_info().vmem_capacity_bytes >= 96 * 1024 * 1024:
                limit = 64 * 1024 * 1024
        except Exception:
            pass
        _VMEM_LIMIT = limit
    return _VMEM_LIMIT


def _round_up(x, m):
    return ((x + m - 1) // m) * m


def _pick_tile(dim, max_tile, align):
    """Full-dim block when the dim fits (always legal w.r.t. the (8,128) rule and
    avoids any padding); otherwise the largest `align`-multiple <= max_tile."""
    if dim <= max_tile:
        return dim
    return max(align, (max_tile // align) * align)


# -----------------------------------------------------------------------------
# Tiled linear (matmul + bias [+ relu]) with f32 K-reduction accumulator
# -----------------------------------------------------------------------------
def _matmul_kernel(x_ref, w_ref, b_ref, o_ref, acc_ref, *, activation, compute_dtype):
    @pl.when(pl.program_id(2) == 0)
    def _():
        acc_ref[...] = jnp.zeros_like(acc_ref)

    acc_ref[...] += jnp.dot(
        x_ref[...].astype(compute_dtype),
        w_ref[...].astype(compute_dtype),
        preferred_element_type=jnp.float32,
    )

    @pl.when(pl.program_id(2) == pl.num_programs(2) - 1)
    def _():
        y = acc_ref[...] + b_ref[...]
        if activation == "relu":
            y = jnp.maximum(y, 0.0)
        o_ref[...] = y.astype(o_ref.dtype)


def linear(x, w, b, activation=None, *, out_dtype=None,
           tm=512, tn=512, tk=512, compute_dtype=MATMUL_DTYPE):
    """x: [M, K], w: [K, N], b: [N] -> [M, N], tiled + pipelined."""
    M, K = x.shape
    Kw, N = w.shape
    assert K == Kw
    out_dtype = out_dtype if out_dtype is not None else x.dtype
    tm = _pick_tile(M, tm, 8)
    tk = _pick_tile(K, tk, 128)
    tn = _pick_tile(N, tn, 128)
    Mp, Kp, Np = _round_up(M, tm), _round_up(K, tk), _round_up(N, tn)
    # Fallback padding only; never triggers when dims fit a full-dim block or
    # are tile-aligned.  Zero pads keep the K reduction exact.
    if (Mp, Kp) != (M, K):
        x = jnp.pad(x, ((0, Mp - M), (0, Kp - K)))
    if (Kp, Np) != (K, N):
        w = jnp.pad(w, ((0, Kp - K), (0, Np - N)))
    if Np != N:
        b = jnp.pad(b, (0, Np - N))

    out = pl.pallas_call(
        functools.partial(_matmul_kernel, activation=activation,
                          compute_dtype=compute_dtype),
        out_shape=jax.ShapeDtypeStruct((Mp, Np), out_dtype),
        grid=(Mp // tm, Np // tn, Kp // tk),
        in_specs=[
            pl.BlockSpec((tm, tk), lambda i, j, k: (i, k)),
            pl.BlockSpec((tk, tn), lambda i, j, k: (k, j)),
            pl.BlockSpec((1, tn), lambda i, j, k: (0, j)),
        ],
        out_specs=pl.BlockSpec((tm, tn), lambda i, j, k: (i, j)),
        scratch_shapes=[pltpu.VMEM((tm, tn), jnp.float32)],
        compiler_params=pltpu.CompilerParams(
            dimension_semantics=("parallel", "parallel", "arbitrary"),
            vmem_limit_bytes=_vmem_limit_bytes()),
    )(x, w, b.reshape(1, Np))

    if (Mp, Np) != (M, N):
        out = out[:M, :N]
    return out


# -----------------------------------------------------------------------------
# Matmul fused with (bias + residual-add + LayerNorm) epilogue
# (N is covered by one tile so the LN reduction over features is complete)
# -----------------------------------------------------------------------------
def _matmul_addln_kernel(x_ref, w_ref, b_ref, r_ref, g_ref, bt_ref, o_ref, acc_ref,
                         *, eps, compute_dtype):
    @pl.when(pl.program_id(1) == 0)
    def _():
        acc_ref[...] = jnp.zeros_like(acc_ref)

    acc_ref[...] += jnp.dot(
        x_ref[...].astype(compute_dtype),
        w_ref[...].astype(compute_dtype),
        preferred_element_type=jnp.float32,
    )

    @pl.when(pl.program_id(1) == pl.num_programs(1) - 1)
    def _():
        y = acc_ref[...] + b_ref[...] + r_ref[...].astype(jnp.float32)
        mean = jnp.mean(y, axis=-1, keepdims=True)
        var = jnp.mean((y - mean) ** 2, axis=-1, keepdims=True)   # unbiased=False
        y = (y - mean) * lax.rsqrt(var + eps)                     # rsqrt on the EUP
        o_ref[...] = (y * g_ref[...] + bt_ref[...]).astype(o_ref.dtype)


def linear_add_layernorm(x, w, b, res, gamma, beta, *, eps=1e-12,
                         tm=512, tk=512, compute_dtype=MATMUL_DTYPE):
    """[M,K]@[K,N] + b, then (+res) and LayerNorm over N, all in one kernel."""
    M, K = x.shape
    Kw, N = w.shape
    assert K == Kw and res.shape == (M, N)
    # Keep the row tile modest so tm*N f32 blocks stay small even at large D.
    tm = _pick_tile(M, min(tm, max(8, (2 * 1024 * 1024) // max(4 * N, 1))), 8)
    tk = _pick_tile(K, tk, 128)
    Mp, Kp = _round_up(M, tm), _round_up(K, tk)
    if (Mp, Kp) != (M, K):
        x = jnp.pad(x, ((0, Mp - M), (0, Kp - K)))
    if Mp != M:
        res = jnp.pad(res, ((0, Mp - M), (0, 0)))

    out = pl.pallas_call(
        functools.partial(_matmul_addln_kernel, eps=eps, compute_dtype=compute_dtype),
        out_shape=jax.ShapeDtypeStruct((Mp, N), jnp.float32),
        grid=(Mp // tm, Kp // tk),
        in_specs=[
            pl.BlockSpec((tm, tk), lambda i, k: (i, k)),
            pl.BlockSpec((tk, N), lambda i, k: (k, 0)),
            pl.BlockSpec((1, N), lambda i, k: (0, 0)),
            pl.BlockSpec((tm, N), lambda i, k: (i, 0)),
            pl.BlockSpec((1, N), lambda i, k: (0, 0)),
            pl.BlockSpec((1, N), lambda i, k: (0, 0)),
        ],
        out_specs=pl.BlockSpec((tm, N), lambda i, k: (i, 0)),
        scratch_shapes=[pltpu.VMEM((tm, N), jnp.float32)],
        compiler_params=pltpu.CompilerParams(
            dimension_semantics=("parallel", "arbitrary"),
            vmem_limit_bytes=_vmem_limit_bytes()),
    )(x, w, b.reshape(1, N), res, gamma.reshape(1, N), beta.reshape(1, N))

    if Mp != M:
        out = out[:M]
    return out


# -----------------------------------------------------------------------------
# Attention: grid=(B, Sq/tq), fused qkv / kv slabs sliced in-kernel,
# per-head direct stores, int8 "masked" flag
# -----------------------------------------------------------------------------
def _attn_kernel(q_ref, kv_ref, m_ref, o_ref, *, scale, n_head, d_model, k_off,
                 compute_dtype):
    # q_ref:  [1, tq, >=D]          (q at lanes [0:D])
    # kv_ref: [1, Sk, >=k_off+2D]   (k at [k_off:k_off+D], v at [k_off+D:k_off+2D])
    # m_ref:  [1, tq, Sk] int8      (1 == masked, i.e. reference mask == 0)
    D = d_model
    Dh = D // n_head
    q = q_ref[0][:, :D].astype(jnp.float32) * scale     # fold 1/sqrt(Dh) once
    kv = kv_ref[0]
    neg = m_ref[0] != 0
    # TODO(synk): for long sequences switch to an online-softmax (flash) form
    # with an "arbitrary" Sk grid axis so VMEM stays O(tq*tk) (v7x: 64 MiB).
    for h in range(n_head):                              # unrolled; static lane slices
        lo, hi = h * Dh, (h + 1) * Dh
        qh = q[:, lo:hi].astype(compute_dtype)
        kh = kv[:, k_off + lo:k_off + hi].astype(compute_dtype)
        vh = kv[:, k_off + D + lo:k_off + D + hi].astype(compute_dtype)
        # q.k^T contracting the last dims (no explicit transpose)
        s = lax.dot_general(qh, kh, (((1,), (1,)), ((), ())),
                            preferred_element_type=jnp.float32)
        s = jnp.where(neg, NEG_INF, s)
        s = s - jnp.max(s, axis=-1, keepdims=True)       # stable softmax (f32)
        e = jnp.exp(s)
        p = e * pl.reciprocal(jnp.sum(e, axis=-1, keepdims=True), approx=True)
        o = jnp.dot(p.astype(compute_dtype), vh, preferred_element_type=jnp.float32)
        o_ref[0, :, lo:hi] = o.astype(o_ref.dtype)       # direct per-head store


def attention(q_src, kv_src, neg_mask, scale, n_head, *, d_model, k_off,
              compute_dtype=MATMUL_DTYPE, out_dtype=jnp.float32):
    """q_src: [B,Sq,DQ] (q in first D lanes), kv_src: [B,Sk,DKV] (k,v at k_off),
    neg_mask: [B,Sq,Sk] int8 (1 == masked) -> [B,Sq,D]."""
    B, Sq, DQ = q_src.shape
    _, Sk, DKV = kv_src.shape
    assert DQ >= d_model and DKV >= k_off + 2 * d_model
    tq = Sq
    for cand in (512, 256, 128):                         # extra pipeline/core parallelism
        if Sq > cand and Sq % cand == 0:
            tq = cand
            break
    return pl.pallas_call(
        functools.partial(_attn_kernel, scale=scale, n_head=n_head,
                          d_model=d_model, k_off=k_off, compute_dtype=compute_dtype),
        out_shape=jax.ShapeDtypeStruct((B, Sq, d_model), out_dtype),
        grid=(B, Sq // tq),
        in_specs=[
            pl.BlockSpec((1, tq, DQ), lambda b, qi: (b, qi, 0)),
            pl.BlockSpec((1, Sk, DKV), lambda b, qi: (b, 0, 0)),
            pl.BlockSpec((1, tq, Sk), lambda b, qi: (b, qi, 0)),
        ],
        out_specs=pl.BlockSpec((1, tq, d_model), lambda b, qi: (b, qi, 0)),
        compiler_params=pltpu.CompilerParams(
            dimension_semantics=("parallel", "parallel"),
            vmem_limit_bytes=_vmem_limit_bytes()),
    )(q_src, kv_src, neg_mask)


# -----------------------------------------------------------------------------
# Model composition (glue in plain JAX, hot paths in Pallas)
# -----------------------------------------------------------------------------
def decoder_layer(dec, enc, t_neg, s_neg, p, n_head):
    B, S, D = dec.shape
    Sk = enc.shape[1]
    scale = 1.0 / math.sqrt(D // n_head)
    dec2d = dec.reshape(B * S, D)

    # --- masked self-attention: fused QKV proj -> attention -> (o-proj + res + LN1) ---
    qkv = linear(dec2d, p["attn1"]["wqkv"], p["attn1"]["bqkv"],
                 out_dtype=MATMUL_DTYPE).reshape(B, S, 3 * D)
    a = attention(qkv, qkv, t_neg, scale, n_head, d_model=D, k_off=D)
    x = linear_add_layernorm(a.reshape(B * S, D), p["attn1"]["wo"], p["attn1"]["bo"],
                             dec2d, p["g1"], p["b1"]).reshape(B, S, D)

    # --- cross-attention: Q proj + fused KV proj -> attention -> (o-proj + res + LN2) ---
    x2d = x.reshape(B * S, D)
    q = linear(x2d, p["attn2"]["wq"], p["attn2"]["bq"],
               out_dtype=MATMUL_DTYPE).reshape(B, S, D)
    kv = linear(enc.reshape(B * Sk, D), p["attn2"]["wkv"], p["attn2"]["bkv"],
                out_dtype=MATMUL_DTYPE).reshape(B, Sk, 2 * D)
    a = attention(q, kv, s_neg, scale, n_head, d_model=D, k_off=0)
    x = linear_add_layernorm(a.reshape(B * S, D), p["attn2"]["wo"], p["attn2"]["bo"],
                             x2d, p["g2"], p["b2"]).reshape(B, S, D)

    # --- FFN: relu matmul -> (second matmul + res + LN3) ---
    x2d = x.reshape(B * S, D)
    h = linear(x2d, p["fw1"], p["fb1"], activation="relu", out_dtype=MATMUL_DTYPE)
    x = linear_add_layernorm(h, p["fw2"], p["fb2"],
                             x2d, p["g3"], p["b3"]).reshape(B, S, D)
    return x


def decoder_forward(dec_tokens, enc, t_mask, s_mask, params, n_head):
    # TransformerEmbedding: token lookup + sinusoidal PE (dropout = identity).
    # TODO(synk): the embedding gather stays in plain JAX (no clean tiled form).
    B, S = dec_tokens.shape
    dec = jnp.take(params["emb"], dec_tokens, axis=0) + params["pe"][:S][None]
    # masked_fill(mask == 0, -1e9): precompute the "masked" flag once as int8
    # (4x less mask DMA than f32; reused by every layer).
    t_neg = (t_mask[:, 0] == 0).astype(jnp.int8)
    s_neg = (s_mask[:, 0] == 0).astype(jnp.int8)
    x = dec
    for lp in params["layers"]:
        # NOTE: intentionally passes `dec` (not x) each iteration, matching the
        # reference forward's `x = layer(dec, enc, t_mask, s_mask)`.
        x = decoder_layer(dec, enc, t_neg, s_neg, lp, n_head)
    D = x.shape[-1]
    logits = linear(x.reshape(B * S, D), params["w_out"], params["b_out"],
                    out_dtype=jnp.float32)
    return logits.reshape(B, S, -1)


# -----------------------------------------------------------------------------
# Deterministic parameter init (matmul weights stored bf16; bias/LN params f32)
# -----------------------------------------------------------------------------
def init_linear_params(key, din, dout, scale=0.02):
    kw, kb = jax.random.split(key)
    w = (jax.random.normal(kw, (din, dout), jnp.float32) * scale).astype(MATMUL_DTYPE)
    b = jax.random.normal(kb, (dout,), jnp.float32) * scale
    return w, b


def init_attn_params(key, d_model):
    ks = jax.random.split(key, 4)
    wq, bq = init_linear_params(ks[0], d_model, d_model)
    wk, bk = init_linear_params(ks[1], d_model, d_model)
    wv, bv = init_linear_params(ks[2], d_model, d_model)
    wo, bo = init_linear_params(ks[3], d_model, d_model)
    return dict(
        wq=wq, bq=bq,
        wkv=jnp.concatenate([wk, wv], axis=1),
        bkv=jnp.concatenate([bk, bv]),
        wqkv=jnp.concatenate([wq, wk, wv], axis=1),
        bqkv=jnp.concatenate([bq, bk, bv]),
        wo=wo, bo=bo,
    )


def init_layer_params(key, d_model, ffn_hidden):
    ks = jax.random.split(key, 4)
    p = dict(
        attn1=init_attn_params(ks[0], d_model),
        attn2=init_attn_params(ks[1], d_model),
        g1=jnp.ones((d_model,), jnp.float32), b1=jnp.zeros((d_model,), jnp.float32),
        g2=jnp.ones((d_model,), jnp.float32), b2=jnp.zeros((d_model,), jnp.float32),
        g3=jnp.ones((d_model,), jnp.float32), b3=jnp.zeros((d_model,), jnp.float32),
    )
    p["fw1"], p["fb1"] = init_linear_params(ks[2], d_model, ffn_hidden)
    p["fw2"], p["fb2"] = init_linear_params(ks[3], ffn_hidden, d_model)
    return p


def sinusoidal_pe(max_len, d_model):
    pos = jnp.arange(max_len, dtype=jnp.float32)[:, None]
    i = jnp.arange(0, d_model, 2, dtype=jnp.float32)
    div = jnp.exp(-(i / d_model) * math.log(10000.0))
    pe = jnp.zeros((max_len, d_model), jnp.float32)
    pe = pe.at[:, 0::2].set(jnp.sin(pos * div))
    pe = pe.at[:, 1::2].set(jnp.cos(pos * div))
    return pe


def init_decoder_params(key, dec_voc_size, max_len, d_model, ffn_hidden, n_layer):
    ks = jax.random.split(key, n_layer + 2)
    emb = jax.random.normal(ks[0], (dec_voc_size, d_model), jnp.float32) * 0.02
    layers = [init_layer_params(ks[1 + l], d_model, ffn_hidden) for l in range(n_layer)]
    w_out, b_out = init_linear_params(ks[-1], d_model, dec_voc_size)
    return dict(emb=emb, pe=sinusoidal_pe(max_len, d_model),
                layers=layers, w_out=w_out, b_out=b_out)


# -----------------------------------------------------------------------------
if __name__ == "__main__":
    # small, shape-consistent config
    B, S, d_model, ffn_hidden, n_head, n_layer = 2, 8, 32, 64, 4, 2
    dec_voc_size, max_len = 50, 16

    key = jax.random.PRNGKey(0)
    k_par, k_tok, k_enc = jax.random.split(key, 3)

    params = init_decoder_params(k_par, dec_voc_size, max_len, d_model, ffn_hidden, n_layer)

    dec_tokens = jax.random.randint(k_tok, (B, S), 0, dec_voc_size, dtype=jnp.int32)
    enc = jax.random.normal(k_enc, (B, S, d_model), jnp.float32)
    # causal target mask [B,1,S,S]; full source mask [B,1,S,S]
    t_mask = jnp.broadcast_to(jnp.tril(jnp.ones((S, S), jnp.float32)), (B, 1, S, S))
    s_mask = jnp.ones((B, 1, S, S), jnp.float32)

    fwd = jax.jit(decoder_forward, static_argnums=(5,))
    out = fwd(dec_tokens, enc, t_mask, s_mask, params, n_head)
    out = jax.block_until_ready(out)
    assert out.shape == (B, S, dec_voc_size)
    print("KERNEL_OK")
</pallas_src>

<mosaic_0001>
module attributes {stable_mosaic.version = 11 : i64} {
  func.func @_matmul_kernel(%arg0: i32, %arg1: i32, %arg2: i32, %arg3: memref<16x32xf32, #tpu.memory_space<vmem>>, %arg4: memref<32x96xbf16, #tpu.memory_space<vmem>>, %arg5: memref<1x96xf32, #tpu.memory_space<vmem>>, %arg6: memref<16x96xbf16, #tpu.memory_space<vmem>>, %arg7: memref<16x96xf32, #tpu.memory_space<vmem>>) attributes {dimension_semantics = [#tpu.dimension_semantics<parallel>, #tpu.dimension_semantics<parallel>, #tpu.dimension_semantics<arbitrary>], iteration_bounds = array<i64: 1, 1, 1>, scalar_prefetch = 0 : i64, scratch_operands = 1 : i64, tpu.core_type = #tpu.core_type<tc>, window_params = [{transform_indices = @transform_0, window_bounds = array<i64: 16, 32>}, {transform_indices = @transform_1, window_bounds = array<i64: 32, 96>}, {transform_indices = @transform_2, window_bounds = array<i64: 1, 96>}, {transform_indices = @transform_3, window_bounds = array<i64: 16, 96>}]} {
    %c0_i32 = arith.constant 0 : i32
    %0 = arith.cmpi eq, %arg2, %c0_i32 : i32
    %1 = arith.extui %0 : i1 to i32
    %c0_i32_0 = arith.constant 0 : i32
    %2 = arith.cmpi ne, %1, %c0_i32_0 : i32
    scf.if %2 {
      %cst_10 = arith.constant 0.000000e+00 : f32
      %13 = vector.broadcast %cst_10 : f32 to vector<16x96xf32>
      %c0_11 = arith.constant 0 : index
      %c0_12 = arith.constant 0 : index
      %14 = vector.load %arg7[%c0_11, %c0_12] : memref<16x96xf32, #tpu.memory_space<vmem>>, vector<16x96xf32>
      tpu.vector_store %arg7[%c0_11, %c0_12], %13 {strides = array<i32>} : memref<16x96xf32, #tpu.memory_space<vmem>>, vector<16x96xf32>,
    } else {
    }
    %c0 = arith.constant 0 : index
    %c0_1 = arith.constant 0 : index
    %3 = vector.load %arg7[%c0, %c0_1] : memref<16x96xf32, #tpu.memory_space<vmem>>, vector<16x96xf32>
    %c0_2 = arith.constant 0 : index
    %c0_3 = arith.constant 0 : index
    %4 = vector.load %arg3[%c0_2, %c0_3] : memref<16x32xf32, #tpu.memory_space<vmem>>, vector<16x32xf32>
    %5 = arith.truncf %4 : vector<16x32xf32> to vector<16x32xbf16>
    %c0_4 = arith.constant 0 : index
    %c0_5 = arith.constant 0 : index
    %6 = vector.load %arg4[%c0_4, %c0_5] : memref<32x96xbf16, #tpu.memory_space<vmem>>, vector<32x96xbf16>
    %cst = arith.constant dense<0.000000e+00> : vector<16x96xf32>
    %7 = tpu.matmul %5, %6, %cst {dimension_numbers = #tpu.dot_dimension_numbers<[1], [0], [0], [1], [0, 0, 1, 1], [], []>} : vector<16x32xbf16>, vector<32x96xbf16>, vector<16x96xf32> -> vector<16x96xf32>
    %8 = arith.addf %3, %7 : vector<16x96xf32>
    %c0_6 = arith.constant 0 : index
    %c0_7 = arith.constant 0 : index
    %9 = vector.load %arg7[%c0_6, %c0_7] : memref<16x96xf32, #tpu.memory_space<vmem>>, vector<16x96xf32>
    tpu.vector_store %arg7[%c0_6, %c0_7], %8 {strides = array<i32>} : memref<16x96xf32, #tpu.memory_space<vmem>>, vector<16x96xf32>,
    %c0_i32_8 = arith.constant 0 : i32
    %10 = arith.cmpi eq, %arg2, %c0_i32_8 : i32
    %11 = arith.extui %10 : i1 to i32
    %c0_i32_9 = arith.constant 0 : i32
    %12 = arith.cmpi ne, %11, %c0_i32_9 : i32
    scf.if %12 {
      %c0_10 = arith.constant 0 : index
      %c0_11 = arith.constant 0 : index
      %13 = vector.load %arg7[%c0_10, %c0_11] : memref<16x96xf32, #tpu.memory_space<vmem>>, vector<16x96xf32>
      %c0_12 = arith.constant 0 : index
      %c0_13 = arith.constant 0 : index
      %14 = vector.load %arg5[%c0_12, %c0_13] : memref<1x96xf32, #tpu.memory_space<vmem>>, vector<1x96xf32>
      %15 = vector.broadcast %14 : vector<1x96xf32> to vector<16x96xf32>
      %16 = arith.addf %13, %15 : vector<16x96xf32>
      %17 = arith.truncf %16 : vector<16x96xf32> to vector<16x96xbf16>
      %c0_14 = arith.constant 0 : index
      %c0_15 = arith.constant 0 : index
      %18 = vector.load %arg6[%c0_14, %c0_15] : memref<16x96xbf16, #tpu.memory_space<vmem>>, vector<16x96xbf16>
      tpu.vector_store %arg6[%c0_14, %c0_15], %17 {strides = array<i32>} : memref<16x96xbf16, #tpu.memory_space<vmem>>, vector<16x96xbf16>,
    } else {
    }
    return
  }
  func.func @transform_0(%arg0: i32, %arg1: i32, %arg2: i32) -> (i32, i32) {
    %c0_i32 = arith.constant 0 : i32
    return %arg0, %arg2 : i32, i32
  }
  func.func @transform_1(%arg0: i32, %arg1: i32, %arg2: i32) -> (i32, i32) {
    %c0_i32 = arith.constant 0 : i32
    return %arg2, %arg1 : i32, i32
  }
  func.func @transform_2(%arg0: i32, %arg1: i32, %arg2: i32) -> (i32, i32) {
    %c0_i32 = arith.constant 0 : i32
    %c0_i32_0 = arith.constant 0 : i32
    return %c0_i32, %arg1 : i32, i32
  }
  func.func @transform_3(%arg0: i32, %arg1: i32, %arg2: i32) -> (i32, i32) {
    %c0_i32 = arith.constant 0 : i32
    return %arg0, %arg1 : i32, i32
  }
}

module attributes {stable_mosaic.version = 11 : i64} {
  func.func @_matmul_addln_kernel(%arg0: i32, %arg1: i32, %arg2: memref<16x32xf32, #tpu.memory_space<vmem>>, %arg3: memref<32x32xbf16, #tpu.memory_space<vmem>>, %arg4: memref<1x32xf32, #tpu.memory_space<vmem>>, %arg5: memref<16x32xf32, #tpu.memory_space<vmem>>, %arg6: memref<1x32xf32, #tpu.memory_space<vmem>>, %arg7: memref<1x32xf32, #tpu.memory_space<vmem>>, %arg8: memref<16x32xf32, #tpu.memory_space<vmem>>, %arg9: memref<16x32xf32, #tpu.memory_space<vmem>>) attributes {dimension_semantics = [#tpu.dimension_semantics<parallel>, #tpu.dimension_semantics<arbitrary>], iteration_bounds = array<i64: 1, 1>, scalar_prefetch = 0 : i64, scratch_operands = 1 : i64, tpu.core_type = #tpu.core_type<tc>, window_params = [{transform_indices = @transform_0, window_bounds = array<i64: 16, 32>}, {transform_indices = @transform_1, window_bounds = array<i64: 32, 32>}, {pipeline_mode = #tpu.pipeline_mode<synchronous>, transform_indices = @transform_2, window_bounds = array<i64: 1, 32>}, {transform_indices = @transform_3, window_bounds = array<i64: 16, 32>}, {pipeline_mode = #tpu.pipeline_mode<synchronous>, transform_indices = @transform_4, window_bounds = array<i64: 1, 32>}, {pipeline_mode = #tpu.pipeline_mode<synchronous>, transform_indices = @transform_5, window_bounds = array<i64: 1, 32>}, {transform_indices = @transform_6, window_bounds = array<i64: 16, 32>}]} {
    %c0_i32 = arith.constant 0 : i32
    %0 = arith.cmpi eq, %arg1, %c0_i32 : i32
    %1 = arith.extui %0 : i1 to i32
    %c0_i32_0 = arith.constant 0 : i32
    %2 = arith.cmpi ne, %1, %c0_i32_0 : i32
    scf.if %2 {
      %cst_10 = arith.constant 0.000000e+00 : f32
      %13 = vector.broadcast %cst_10 : f32 to vector<16x32xf32>
      %c0_11 = arith.constant 0 : index
      %c0_12 = arith.constant 0 : index
      %14 = vector.load %arg9[%c0_11, %c0_12] : memref<16x32xf32, #tpu.memory_space<vmem>>, vector<16x32xf32>
      tpu.vector_store %arg9[%c0_11, %c0_12], %13 {strides = array<i32>} : memref<16x32xf32, #tpu.memory_space<vmem>>, vector<16x32xf32>,
    } else {
    }
    %c0 = arith.constant 0 : index
    %c0_1 = arith.constant 0 : index
    %3 = vector.load %arg9[%c0, %c0_1] : memref<16x32xf32, #tpu.memory_space<vmem>>, vector<16x32xf32>
    %c0_2 = arith.constant 0 : index
    %c0_3 = arith.constant 0 : index
    %4 = vector.load %arg2[%c0_2, %c0_3] : memref<16x32xf32, #tpu.memory_space<vmem>>, vector<16x32xf32>
    %5 = arith.truncf %4 : vector<16x32xf32> to vector<16x32xbf16>
    %c0_4 = arith.constant 0 : index
    %c0_5 = arith.constant 0 : index
    %6 = vector.load %arg3[%c0_4, %c0_5] : memref<32x32xbf16, #tpu.memory_space<vmem>>, vector<32x32xbf16>
    %cst = arith.constant dense<0.000000e+00> : vector<16x32xf32>
    %7 = tpu.matmul %5, %6, %cst {dimension_numbers = #tpu.dot_dimension_numbers<[1], [0], [0], [1], [0, 0, 1, 1], [], []>} : vector<16x32xbf16>, vector<32x32xbf16>, vector<16x32xf32> -> vector<16x32xf32>
    %8 = arith.addf %3, %7 : vector<16x32xf32>
    %c0_6 = arith.constant 0 : index
    %c0_7 = arith.constant 0 : index
    %9 = vector.load %arg9[%c0_6, %c0_7] : memref<16x32xf32, #tpu.memory_space<vmem>>, vector<16x32xf32>
    tpu.vector_store %arg9[%c0_6, %c0_7], %8 {strides = array<i32>} : memref<16x32xf32, #tpu.memory_space<vmem>>, vector<16x32xf32>,
    %c0_i32_8 = arith.constant 0 : i32
    %10 = arith.cmpi eq, %arg1, %c0_i32_8 : i32
    %11 = arith.extui %10 : i1 to i32
    %c0_i32_9 = arith.constant 0 : i32
    %12 = arith.cmpi ne, %11, %c0_i32_9 : i32
    scf.if %12 {
      %c0_10 = arith.constant 0 : index
      %c0_11 = arith.constant 0 : index
      %13 = vector.load %arg9[%c0_10, %c0_11] : memref<16x32xf32, #tpu.memory_space<vmem>>, vector<16x32xf32>
      %c0_12 = arith.constant 0 : index
      %c0_13 = arith.constant 0 : index
      %14 = vector.load %arg4[%c0_12, %c0_13] : memref<1x32xf32, #tpu.memory_space<vmem>>, vector<1x32xf32>
      %15 = vector.broadcast %14 : vector<1x32xf32> to vector<16x32xf32>
      %16 = arith.addf %13, %15 : vector<16x32xf32>
      %c0_14 = arith.constant 0 : index
      %c0_15 = arith.constant 0 : index
      %17 = vector.load %arg5[%c0_14, %c0_15] : memref<16x32xf32, #tpu.memory_space<vmem>>, vector<16x32xf32>
      %18 = arith.addf %16, %17 : vector<16x32xf32>
      %cst_16 = arith.constant dense<0.000000e+00> : vector<16xf32>
      %19 = vector.multi_reduction <add>, %18, %cst_16 [1] : vector<16x32xf32> to vector<16xf32>
      %20 = vector.shape_cast %19 : vector<16xf32> to vector<16x1xf32>
      %cst_17 = arith.constant 3.200000e+01 : f32
      %21 = vector.broadcast %cst_17 : f32 to vector<16x1xf32>
      %22 = arith.divf %20, %21 : vector<16x1xf32>
      %23 = vector.broadcast %22 : vector<16x1xf32> to vector<16x32xf32>
      %24 = arith.subf %18, %23 : vector<16x32xf32>
      %25 = arith.mulf %24, %24 : vector<16x32xf32>
      %cst_18 = arith.constant dense<0.000000e+00> : vector<16xf32>
      %26 = vector.multi_reduction <add>, %25, %cst_18 [1] : vector<16x32xf32> to vector<16xf32>
      %27 = vector.shape_cast %26 : vector<16xf32> to vector<16x1xf32>
      %cst_19 = arith.constant 3.200000e+01 : f32
      %28 = vector.broadcast %cst_19 : f32 to vector<16x1xf32>
      %29 = arith.divf %27, %28 : vector<16x1xf32>
      %30 = vector.broadcast %22 : vector<16x1xf32> to vector<16x32xf32>
      %31 = arith.subf %18, %30 : vector<16x32xf32>
      %cst_20 = arith.constant 9.99999996E-13 : f32
      %32 = vector.broadcast %cst_20 : f32 to vector<16x1xf32>
      %33 = arith.addf %29, %32 : vector<16x1xf32>
      %34 = math.rsqrt %33 : vector<16x1xf32>
      %35 = vector.broadcast %34 : vector<16x1xf32> to vector<16x32xf32>
      %36 = arith.mulf %31, %35 : vector<16x32xf32>
      %c0_21 = arith.constant 0 : index
      %c0_22 = arith.constant 0 : index
      %37 = vector.load %arg6[%c0_21, %c0_22] : memref<1x32xf32, #tpu.memory_space<vmem>>, vector<1x32xf32>
      %38 = vector.broadcast %37 : vector<1x32xf32> to vector<16x32xf32>
      %39 = arith.mulf %36, %38 : vector<16x32xf32>
      %c0_23 = arith.constant 0 : index
      %c0_24 = arith.constant 0 : index
      %40 = vector.load %arg7[%c0_23, %c0_24] : memref<1x32xf32, #tpu.memory_space<vmem>>, vector<1x32xf32>
      %41 = vector.broadcast %40 : vector<1x32xf32> to vector<16x32xf32>
      %42 = arith.addf %39, %41 : vector<16x32xf32>
      %c0_25 = arith.constant 0 : index
      %c0_26 = arith.constant 0 : index
      %43 = vector.load %arg8[%c0_25, %c0_26] : memref<16x32xf32, #tpu.memory_space<vmem>>, vector<16x32xf32>
      tpu.vector_store %arg8[%c0_25, %c0_26], %42 {strides = array<i32>} : memref<16x32xf32, #tpu.memory_space<vmem>>, vector<16x32xf32>,
    } else {
    }
    return
  }
  func.func @transform_0(%arg0: i32, %arg1: i32) -> (i32, i32) {
    %c0_i32 = arith.constant 0 : i32
    return %arg0, %arg1 : i32, i32
  }
  func.func @transform_1(%arg0: i32, %arg1: i32) -> (i32, i32) {
    %c0_i32 = arith.constant 0 : i32
    %c0_i32_0 = arith.constant 0 : i32
    return %arg1, %c0_i32 : i32, i32
  }
  func.func @transform_2(%arg0: i32, %arg1: i32) -> (i32, i32) {
    %c0_i32 = arith.constant 0 : i32
    %c0_i32_0 = arith.constant 0 : i32
    %c0_i32_1 = arith.constant 0 : i32
    return %c0_i32, %c0_i32_0 : i32, i32
  }
  func.func @transform_3(%arg0: i32, %arg1: i32) -> (i32, i32) {
    %c0_i32 = arith.constant 0 : i32
    %c0_i32_0 = arith.constant 0 : i32
    return %arg0, %c0_i32 : i32, i32
  }
  func.func @transform_4(%arg0: i32, %arg1: i32) -> (i32, i32) {
    %c0_i32 = arith.constant 0 : i32
    %c0_i32_0 = arith.constant 0 : i32
    %c0_i32_1 = arith.constant 0 : i32
    return %c0_i32, %c0_i32_0 : i32, i32
  }
  func.func @transform_5(%arg0: i32, %arg1: i32) -> (i32, i32) {
    %c0_i32 = arith.constant 0 : i32
    %c0_i32_0 = arith.constant 0 : i32
    %c0_i32_1 = arith.constant 0 : i32
    return %c0_i32, %c0_i32_0 : i32, i32
  }
  func.func @transform_6(%arg0: i32, %arg1: i32) -> (i32, i32) {
    %c0_i32 = arith.constant 0 : i32
    %c0_i32_0 = arith.constant 0 : i32
    return %arg0, %c0_i32 : i32, i32
  }
}

module attributes {stable_mosaic.version = 11 : i64} {
  func.func @_attn_kernel(%arg0: i32, %arg1: i32, %arg2: memref<1x8x96xbf16, #tpu.memory_space<vmem>>, %arg3: memref<1x8x96xbf16, #tpu.memory_space<vmem>>, %arg4: memref<1x8x8xi8, #tpu.memory_space<vmem>>, %arg5: memref<1x8x32xf32, #tpu.memory_space<vmem>>) attributes {dimension_semantics = [#tpu.dimension_semantics<parallel>, #tpu.dimension_semantics<parallel>], iteration_bounds = array<i64: 2, 1>, scalar_prefetch = 0 : i64, scratch_operands = 0 : i64, tpu.core_type = #tpu.core_type<tc>, window_params = [{transform_indices = @transform_0, window_bounds = array<i64: 1, 8, 96>}, {transform_indices = @transform_1, window_bounds = array<i64: 1, 8, 96>}, {transform_indices = @transform_2, window_bounds = array<i64: 1, 8, 8>}, {transform_indices = @transform_3, window_bounds = array<i64: 1, 8, 32>}]} {
    %c0 = arith.constant 0 : index
    %c0_0 = arith.constant 0 : index
    %c0_1 = arith.constant 0 : index
    %0 = vector.load %arg2[%c0, %c0_0, %c0_1] : memref<1x8x96xbf16, #tpu.memory_space<vmem>>, vector<1x8x96xbf16>
    %1 = vector.shape_cast %0 : vector<1x8x96xbf16> to vector<8x96xbf16>
    %2 = vector.extract_strided_slice %1 {offsets = [0, 0], sizes = [8, 32], strides = [1, 1]} : vector<8x96xbf16> to vector<8x32xbf16>
    %3 = arith.extf %2 : vector<8x32xbf16> to vector<8x32xf32>
    %cst = arith.constant 0.353553385 : f32
    %4 = vector.broadcast %cst : f32 to vector<8x32xf32>
    %5 = arith.mulf %3, %4 : vector<8x32xf32>
    %c0_2 = arith.constant 0 : index
    %c0_3 = arith.constant 0 : index
    %c0_4 = arith.constant 0 : index
    %6 = vector.load %arg3[%c0_2, %c0_3, %c0_4] : memref<1x8x96xbf16, #tpu.memory_space<vmem>>, vector<1x8x96xbf16>
    %7 = vector.shape_cast %6 : vector<1x8x96xbf16> to vector<8x96xbf16>
    %c0_5 = arith.constant 0 : index
    %c0_6 = arith.constant 0 : index
    %c0_7 = arith.constant 0 : index
    %8 = vector.load %arg4[%c0_5, %c0_6, %c0_7] : memref<1x8x8xi8, #tpu.memory_space<vmem>>, vector<1x8x8xi8>
    %9 = vector.shape_cast %8 : vector<1x8x8xi8> to vector<8x8xi8>
    %c0_i8 = arith.constant 0 : i8
    %10 = vector.broadcast %c0_i8 : i8 to vector<8x8xi8>
    %11 = arith.cmpi ne, %9, %10 : vector<8x8xi8>
    %12 = vector.extract_strided_slice %5 {offsets = [0, 0], sizes = [8, 8], strides = [1, 1]} : vector<8x32xf32> to vector<8x8xf32>
    %13 = arith.truncf %12 : vector<8x8xf32> to vector<8x8xbf16>
    %14 = vector.extract_strided_slice %7 {offsets = [0, 32], sizes = [8, 8], strides = [1, 1]} : vector<8x96xbf16> to vector<8x8xbf16>
    %15 = vector.extract_strided_slice %7 {offsets = [0, 64], sizes = [8, 8], strides = [1, 1]} : vector<8x96xbf16> to vector<8x8xbf16>
    %cst_8 = arith.constant dense<0.000000e+00> : vector<8x8xf32>
    %16 = tpu.matmul %13, %14, %cst_8 {dimension_numbers = #tpu.dot_dimension_numbers<[1], [1], [0], [0], [0, 0, 1, 0], [], []>} : vector<8x8xbf16>, vector<8x8xbf16>, vector<8x8xf32> -> vector<8x8xf32>
    %cst_9 = arith.constant -1.000000e+09 : f32
    %17 = vector.broadcast %cst_9 : f32 to vector<8x8xf32>
    %18 = arith.select %11, %17, %16 : vector<8x8xi1>, vector<8x8xf32>
    %cst_10 = arith.constant dense<0xFF800000> : vector<8xf32>
    %19 = vector.multi_reduction <maximumf>, %18, %cst_10 [1] : vector<8x8xf32> to vector<8xf32>
    %20 = vector.shape_cast %19 : vector<8xf32> to vector<8x1xf32>
    %21 = vector.broadcast %20 : vector<8x1xf32> to vector<8x8xf32>
    %22 = arith.subf %18, %21 : vector<8x8xf32>
    %23 = math.exp %22 : vector<8x8xf32>
    %cst_11 = arith.constant dense<0.000000e+00> : vector<8xf32>
    %24 = vector.multi_reduction <add>, %23, %cst_11 [1] : vector<8x8xf32> to vector<8xf32>
    %25 = vector.shape_cast %24 : vector<8xf32> to vector<8x1xf32>
    %26 = tpu.reciprocal %25 {approx = true} : vector<8x1xf32> -> vector<8x1xf32>
    %27 = vector.broadcast %26 : vector<8x1xf32> to vector<8x8xf32>
    %28 = arith.mulf %23, %27 : vector<8x8xf32>
    %29 = arith.truncf %28 : vector<8x8xf32> to vector<8x8xbf16>
    %cst_12 = arith.constant dense<0.000000e+00> : vector<8x8xf32>
    %30 = tpu.matmul %29, %15, %cst_12 {dimension_numbers = #tpu.dot_dimension_numbers<[1], [0], [0], [1], [0, 0, 1, 1], [], []>} : vector<8x8xbf16>, vector<8x8xbf16>, vector<8x8xf32> -> vector<8x8xf32>
    %c0_13 = arith.constant 0 : index
    %c0_14 = arith.constant 0 : index
    %c0_15 = arith.constant 0 : index
    %31 = vector.load %arg5[%c0_13, %c0_14, %c0_15] : memref<1x8x32xf32, #tpu.memory_space<vmem>>, vector<1x8x8xf32>
    %32 = vector.shape_cast %31 : vector<1x8x8xf32> to vector<8x8xf32>
    %33 = vector.shape_cast %30 : vector<8x8xf32> to vector<1x8x8xf32>
    tpu.vector_store %arg5[%c0_13, %c0_14, %c0_15], %33 {strides = array<i32>} : memref<1x8x32xf32, #tpu.memory_space<vmem>>, vector<1x8x8xf32>,
    %34 = vector.extract_strided_slice %5 {offsets = [0, 8], sizes = [8, 8], strides = [1, 1]} : vector<8x32xf32> to vector<8x8xf32>
    %35 = arith.truncf %34 : vector<8x8xf32> to vector<8x8xbf16>
    %36 = vector.extract_strided_slice %7 {offsets = [0, 40], sizes = [8, 8], strides = [1, 1]} : vector<8x96xbf16> to vector<8x8xbf16>
    %37 = vector.extract_strided_slice %7 {offsets = [0, 72], sizes = [8, 8], strides = [1, 1]} : vector<8x96xbf16> to vector<8x8xbf16>
    %cst_16 = arith.constant dense<0.000000e+00> : vector<8x8xf32>
    %38 = tpu.matmul %35, %36, %cst_16 {dimension_numbers = #tpu.dot_dimension_numbers<[1], [1], [0], [0], [0, 0, 1, 0], [], []>} : vector<8x8xbf16>, vector<8x8xbf16>, vector<8x8xf32> -> vector<8x8xf32>
    %cst_17 = arith.constant -1.000000e+09 : f32
    %39 = vector.broadcast %cst_17 : f32 to vector<8x8xf32>
    %40 = arith.select %11, %39, %38 : vector<8x8xi1>, vector<8x8xf32>
    %cst_18 = arith.constant dense<0xFF800000> : vector<8xf32>
    %41 = vector.multi_reduction <maximumf>, %40, %cst_18 [1] : vector<8x8xf32> to vector<8xf32>
    %42 = vector.shape_cast %41 : vector<8xf32> to vector<8x1xf32>
    %43 = vector.broadcast %42 : vector<8x1xf32> to vector<8x8xf32>
    %44 = arith.subf %40, %43 : vector<8x8xf32>
    %45 = math.exp %44 : vector<8x8xf32>
    %cst_19 = arith.constant dense<0.000000e+00> : vector<8xf32>
    %46 = vector.multi_reduction <add>, %45, %cst_19 [1] : vector<8x8xf32> to vector<8xf32>
    %47 = vector.shape_cast %46 : vector<8xf32> to vector<8x1xf32>
    %48 = tpu.reciprocal %47 {approx = true} : vector<8x1xf32> -> vector<8x1xf32>
    %49 = vector.broadcast %48 : vector<8x1xf32> to vector<8x8xf32>
    %50 = arith.mulf %45, %49 : vector<8x8xf32>
    %51 = arith.truncf %50 : vector<8x8xf32> to vector<8x8xbf16>
    %cst_20 = arith.constant dense<0.000000e+00> : vector<8x8xf32>
    %52 = tpu.matmul %51, %37, %cst_20 {dimension_numbers = #tpu.dot_dimension_numbers<[1], [0], [0], [1], [0, 0, 1, 1], [], []>} : vector<8x8xbf16>, vector<8x8xbf16>, vector<8x8xf32> -> vector<8x8xf32>
    %c0_21 = arith.constant 0 : index
    %c0_22 = arith.constant 0 : index
    %c8 = arith.constant 8 : index
    %53 = vector.load %arg5[%c0_21, %c0_22, %c8] : memref<1x8x32xf32, #tpu.memory_space<vmem>>, vector<1x8x8xf32>
    %54 = vector.shape_cast %53 : vector<1x8x8xf32> to vector<8x8xf32>
    %55 = vector.shape_cast %52 : vector<8x8xf32> to vector<1x8x8xf32>
    tpu.vector_store %arg5[%c0_21, %c0_22, %c8], %55 {strides = array<i32>} : memref<1x8x32xf32, #tpu.memory_space<vmem>>, vector<1x8x8xf32>,
    %56 = vector.extract_strided_slice %5 {offsets = [0, 16], sizes = [8, 8], strides = [1, 1]} : vector<8x32xf32> to vector<8x8xf32>
    %57 = arith.truncf %56 : vector<8x8xf32> to vector<8x8xbf16>
    %58 = vector.extract_strided_slice %7 {offsets = [0, 48], sizes = [8, 8], strides = [1, 1]} : vector<8x96xbf16> to vector<8x8xbf16>
    %59 = vector.extract_strided_slice %7 {offsets = [0, 80], sizes = [8, 8], strides = [1, 1]} : vector<8x96xbf16> to vector<8x8xbf16>
    %cst_23 = arith.constant dense<0.000000e+00> : vector<8x8xf32>
    %60 = tpu.matmul %57, %58, %cst_23 {dimension_numbers = #tpu.dot_dimension_numbers<[1], [1], [0], [0], [0, 0, 1, 0], [], []>} : vector<8x8xbf16>, vector<8x8xbf16>, vector<8x8xf32> -> vector<8x8xf32>
    %cst_24 = arith.constant -1.000000e+09 : f32
    %61 = vector.broadcast %cst_24 : f32 to vector<8x8xf32>
    %62 = arith.select %11, %61, %60 : vector<8x8xi1>, vector<8x8xf32>
    %cst_25 = arith.constant dense<0xFF800000> : vector<8xf32>
    %63 = vector.multi_reduction <maximumf>, %62, %cst_25 [1] : vector<8x8xf32> to vector<8xf32>
    %64 = vector.shape_cast %63 : vector<8xf32> to vector<8x1xf32>
    %65 = vector.broadcast %64 : vector<8x1xf32> to vector<8x8xf32>
    %66 = arith.subf %62, %65 : vector<8x8xf32>
    %67 = math.exp %66 : vector<8x8xf32>
    %cst_26 = arith.constant dense<0.000000e+00> : vector<8xf32>
    %68 = vector.multi_reduction <add>, %67, %cst_26 [1] : vector<8x8xf32> to vector<8xf32>
    %69 = vector.shape_cast %68 : vector<8xf32> to vector<8x1xf32>
    %70 = tpu.reciprocal %69 {approx = true} : vector<8x1xf32> -> vector<8x1xf32>
    %71 = vector.broadcast %70 : vector<8x1xf32> to vector<8x8xf32>
    %72 = arith.mulf %67, %71 : vector<8x8xf32>
    %73 = arith.truncf %72 : vector<8x8xf32> to vector<8x8xbf16>
    %cst_27 = arith.constant dense<0.000000e+00> : vector<8x8xf32>
    %74 = tpu.matmul %73, %59, %cst_27 {dimension_numbers = #tpu.dot_dimension_numbers<[1], [0], [0], [1], [0, 0, 1, 1], [], []>} : vector<8x8xbf16>, vector<8x8xbf16>, vector<8x8xf32> -> vector<8x8xf32>
    %c0_28 = arith.constant 0 : index
    %c0_29 = arith.constant 0 : index
    %c16 = arith.constant 16 : index
    %75 = vector.load %arg5[%c0_28, %c0_29, %c16] : memref<1x8x32xf32, #tpu.memory_space<vmem>>, vector<1x8x8xf32>
    %76 = vector.shape_cast %75 : vector<1x8x8xf32> to vector<8x8xf32>
    %77 = vector.shape_cast %74 : vector<8x8xf32> to vector<1x8x8xf32>
    tpu.vector_store %arg5[%c0_28, %c0_29, %c16], %77 {strides = array<i32>} : memref<1x8x32xf32, #tpu.memory_space<vmem>>, vector<1x8x8xf32>,
    %78 = vector.extract_strided_slice %5 {offsets = [0, 24], sizes = [8, 8], strides = [1, 1]} : vector<8x32xf32> to vector<8x8xf32>
    %79 = arith.truncf %78 : vector<8x8xf32> to vector<8x8xbf16>
    %80 = vector.extract_strided_slice %7 {offsets = [0, 56], sizes = [8, 8], strides = [1, 1]} : vector<8x96xbf16> to vector<8x8xbf16>
    %81 = vector.extract_strided_slice %7 {offsets = [0, 88], sizes = [8, 8], strides = [1, 1]} : vector<8x96xbf16> to vector<8x8xbf16>
    %cst_30 = arith.constant dense<0.000000e+00> : vector<8x8xf32>
    %82 = tpu.matmul %79, %80, %cst_30 {dimension_numbers = #tpu.dot_dimension_numbers<[1], [1], [0], [0], [0, 0, 1, 0], [], []>} : vector<8x8xbf16>, vector<8x8xbf16>, vector<8x8xf32> -> vector<8x8xf32>
    %cst_31 = arith.constant -1.000000e+09 : f32
    %83 = vector.broadcast %cst_31 : f32 to vector<8x8xf32>
    %84 = arith.select %11, %83, %82 : vector<8x8xi1>, vector<8x8xf32>
    %cst_32 = arith.constant dense<0xFF800000> : vector<8xf32>
    %85 = vector.multi_reduction <maximumf>, %84, %cst_32 [1] : vector<8x8xf32> to vector<8xf32>
    %86 = vector.shape_cast %85 : vector<8xf32> to vector<8x1xf32>
    %87 = vector.broadcast %86 : vector<8x1xf32> to vector<8x8xf32>
    %88 = arith.subf %84, %87 : vector<8x8xf32>
    %89 = math.exp %88 : vector<8x8xf32>
    %cst_33 = arith.constant dense<0.000000e+00> : vector<8xf32>
    %90 = vector.multi_reduction <add>, %89, %cst_33 [1] : vector<8x8xf32> to vector<8xf32>
    %91 = vector.shape_cast %90 : vector<8xf32> to vector<8x1xf32>
    %92 = tpu.reciprocal %91 {approx = true} : vector<8x1xf32> -> vector<8x1xf32>
    %93 = vector.broadcast %92 : vector<8x1xf32> to vector<8x8xf32>
    %94 = arith.mulf %89, %93 : vector<8x8xf32>
    %95 = arith.truncf %94 : vector<8x8xf32> to vector<8x8xbf16>
    %cst_34 = arith.constant dense<0.000000e+00> : vector<8x8xf32>
    %96 = tpu.matmul %95, %81, %cst_34 {dimension_numbers = #tpu.dot_dimension_numbers<[1], [0], [0], [1], [0, 0, 1, 1], [], []>} : vector<8x8xbf16>, vector<8x8xbf16>, vector<8x8xf32> -> vector<8x8xf32>
    %c0_35 = arith.constant 0 : index
    %c0_36 = arith.constant 0 : index
    %c24 = arith.constant 24 : index
    %97 = vector.load %arg5[%c0_35, %c0_36, %c24] : memref<1x8x32xf32, #tpu.memory_space<vmem>>, vector<1x8x8xf32>
    %98 = vector.shape_cast %97 : vector<1x8x8xf32> to vector<8x8xf32>
    %99 = vector.shape_cast %96 : vector<8x8xf32> to vector<1x8x8xf32>
    tpu.vector_store %arg5[%c0_35, %c0_36, %c24], %99 {strides = array<i32>} : memref<1x8x32xf32, #tpu.memory_space<vmem>>, vector<1x8x8xf32>,
    return
  }
  func.func @transform_0(%arg0: i32, %arg1: i32) -> (i32, i32, i32) {
    %c0_i32 = arith.constant 0 : i32
    %c0_i32_0 = arith.constant 0 : i32
    return %arg0, %arg1, %c0_i32 : i32, i32, i32
  }
  func.func @transform_1(%arg0: i32, %arg1: i32) -> (i32, i32, i32) {
    %c0_i32 = arith.constant 0 : i32
    %c0_i32_0 = arith.constant 0 : i32
    %c0_i32_1 = arith.constant 0 : i32
    return %arg0, %c0_i32, %c0_i32_0 : i32, i32, i32
  }
  func.func @transform_2(%arg0: i32, %arg1: i32) -> (i32, i32, i32) {
    %c0_i32 = arith.constant 0 : i32
    %c0_i32_0 = arith.constant 0 : i32
    return %arg0, %arg1, %c0_i32 : i32, i32, i32
  }
  func.func @transform_3(%arg0: i32, %arg1: i32) -> (i32, i32, i32) {
    %c0_i32 = arith.constant 0 : i32
    %c0_i32_0 = arith.constant 0 : i32
    return %arg0, %arg1, %c0_i32 : i32, i32, i32
  }
}

module attributes {stable_mosaic.version = 11 : i64} {
  func.func @_matmul_kernel(%arg0: i32, %arg1: i32, %arg2: i32, %arg3: memref<16x32xf32, #tpu.memory_space<vmem>>, %arg4: memref<32x32xbf16, #tpu.memory_space<vmem>>, %arg5: memref<1x32xf32, #tpu.memory_space<vmem>>, %arg6: memref<16x32xbf16, #tpu.memory_space<vmem>>, %arg7: memref<16x32xf32, #tpu.memory_space<vmem>>) attributes {dimension_semantics = [#tpu.dimension_semantics<parallel>, #tpu.dimension_semantics<parallel>, #tpu.dimension_semantics<arbitrary>], iteration_bounds = array<i64: 1, 1, 1>, scalar_prefetch = 0 : i64, scratch_operands = 1 : i64, tpu.core_type = #tpu.core_type<tc>, window_params = [{transform_indices = @transform_0, window_bounds = array<i64: 16, 32>}, {transform_indices = @transform_1, window_bounds = array<i64: 32, 32>}, {transform_indices = @transform_2, window_bounds = array<i64: 1, 32>}, {transform_indices = @transform_3, window_bounds = array<i64: 16, 32>}]} {
    %c0_i32 = arith.constant 0 : i32
    %0 = arith.cmpi eq, %arg2, %c0_i32 : i32
    %1 = arith.extui %0 : i1 to i32
    %c0_i32_0 = arith.constant 0 : i32
    %2 = arith.cmpi ne, %1, %c0_i32_0 : i32
    scf.if %2 {
      %cst_10 = arith.constant 0.000000e+00 : f32
      %13 = vector.broadcast %cst_10 : f32 to vector<16x32xf32>
      %c0_11 = arith.constant 0 : index
      %c0_12 = arith.constant 0 : index
      %14 = vector.load %arg7[%c0_11, %c0_12] : memref<16x32xf32, #tpu.memory_space<vmem>>, vector<16x32xf32>
      tpu.vector_store %arg7[%c0_11, %c0_12], %13 {strides = array<i32>} : memref<16x32xf32, #tpu.memory_space<vmem>>, vector<16x32xf32>,
    } else {
    }
    %c0 = arith.constant 0 : index
    %c0_1 = arith.constant 0 : index
    %3 = vector.load %arg7[%c0, %c0_1] : memref<16x32xf32, #tpu.memory_space<vmem>>, vector<16x32xf32>
    %c0_2 = arith.constant 0 : index
    %c0_3 = arith.constant 0 : index
    %4 = vector.load %arg3[%c0_2, %c0_3] : memref<16x32xf32, #tpu.memory_space<vmem>>, vector<16x32xf32>
    %5 = arith.truncf %4 : vector<16x32xf32> to vector<16x32xbf16>
    %c0_4 = arith.constant 0 : index
    %c0_5 = arith.constant 0 : index
    %6 = vector.load %arg4[%c0_4, %c0_5] : memref<32x32xbf16, #tpu.memory_space<vmem>>, vector<32x32xbf16>
    %cst = arith.constant dense<0.000000e+00> : vector<16x32xf32>
    %7 = tpu.matmul %5, %6, %cst {dimension_numbers = #tpu.dot_dimension_numbers<[1], [0], [0], [1], [0, 0, 1, 1], [], []>} : vector<16x32xbf16>, vector<32x32xbf16>, vector<16x32xf32> -> vector<16x32xf32>
    %8 = arith.addf %3, %7 : vector<16x32xf32>
    %c0_6 = arith.constant 0 : index
    %c0_7 = arith.constant 0 : index
    %9 = vector.load %arg7[%c0_6, %c0_7] : memref<16x32xf32, #tpu.memory_space<vmem>>, vector<16x32xf32>
    tpu.vector_store %arg7[%c0_6, %c0_7], %8 {strides = array<i32>} : memref<16x32xf32, #tpu.memory_space<vmem>>, vector<16x32xf32>,
    %c0_i32_8 = arith.constant 0 : i32
    %10 = arith.cmpi eq, %arg2, %c0_i32_8 : i32
    %11 = arith.extui %10 : i1 to i32
    %c0_i32_9 = arith.constant 0 : i32
    %12 = arith.cmpi ne, %11, %c0_i32_9 : i32
    scf.if %12 {
      %c0_10 = arith.constant 0 : index
      %c0_11 = arith.constant 0 : index
      %13 = vector.load %arg7[%c0_10, %c0_11] : memref<16x32xf32, #tpu.memory_space<vmem>>, vector<16x32xf32>
      %c0_12 = arith.constant 0 : index
      %c0_13 = arith.constant 0 : index
      %14 = vector.load %arg5[%c0_12, %c0_13] : memref<1x32xf32, #tpu.memory_space<vmem>>, vector<1x32xf32>
      %15 = vector.broadcast %14 : vector<1x32xf32> to vector<16x32xf32>
      %16 = arith.addf %13, %15 : vector<16x32xf32>
      %17 = arith.truncf %16 : vector<16x32xf32> to vector<16x32xbf16>
      %c0_14 = arith.constant 0 : index
      %c0_15 = arith.constant 0 : index
      %18 = vector.load %arg6[%c0_14, %c0_15] : memref<16x32xbf16, #tpu.memory_space<vmem>>, vector<16x32xbf16>
      tpu.vector_store %arg6[%c0_14, %c0_15], %17 {strides = array<i32>} : memref<16x32xbf16, #tpu.memory_space<vmem>>, vector<16x32xbf16>,
    } else {
    }
    return
  }
  func.func @transform_0(%arg0: i32, %arg1: i32, %arg2: i32) -> (i32, i32) {
    %c0_i32 = arith.constant 0 : i32
    return %arg0, %arg2 : i32, i32
  }
  func.func @transform_1(%arg0: i32, %arg1: i32, %arg2: i32) -> (i32, i32) {
    %c0_i32 = arith.constant 0 : i32
    return %arg2, %arg1 : i32, i32
  }
  func.func @transform_2(%arg0: i32, %arg1: i32, %arg2: i32) -> (i32, i32) {
    %c0_i32 = arith.constant 0 : i32
    %c0_i32_0 = arith.constant 0 : i32
    return %c0_i32, %arg1 : i32, i32
  }
  func.func @transform_3(%arg0: i32, %arg1: i32, %arg2: i32) -> (i32, i32) {
    %c0_i32 = arith.constant 0 : i32
    return %arg0, %arg1 : i32, i32
  }
}

module attributes {stable_mosaic.version = 11 : i64} {
  func.func @_matmul_kernel(%arg0: i32, %arg1: i32, %arg2: i32, %arg3: memref<16x32xf32, #tpu.memory_space<vmem>>, %arg4: memref<32x64xbf16, #tpu.memory_space<vmem>>, %arg5: memref<1x64xf32, #tpu.memory_space<vmem>>, %arg6: memref<16x64xbf16, #tpu.memory_space<vmem>>, %arg7: memref<16x64xf32, #tpu.memory_space<vmem>>) attributes {dimension_semantics = [#tpu.dimension_semantics<parallel>, #tpu.dimension_semantics<parallel>, #tpu.dimension_semantics<arbitrary>], iteration_bounds = array<i64: 1, 1, 1>, scalar_prefetch = 0 : i64, scratch_operands = 1 : i64, tpu.core_type = #tpu.core_type<tc>, window_params = [{transform_indices = @transform_0, window_bounds = array<i64: 16, 32>}, {transform_indices = @transform_1, window_bounds = array<i64: 32, 64>}, {transform_indices = @transform_2, window_bounds = array<i64: 1, 64>}, {transform_indices = @transform_3, window_bounds = array<i64: 16, 64>}]} {
    %c0_i32 = arith.constant 0 : i32
    %0 = arith.cmpi eq, %arg2, %c0_i32 : i32
    %1 = arith.extui %0 : i1 to i32
    %c0_i32_0 = arith.constant 0 : i32
    %2 = arith.cmpi ne, %1, %c0_i32_0 : i32
    scf.if %2 {
      %cst_10 = arith.constant 0.000000e+00 : f32
      %13 = vector.broadcast %cst_10 : f32 to vector<16x64xf32>
      %c0_11 = arith.constant 0 : index
      %c0_12 = arith.constant 0 : index
      %14 = vector.load %arg7[%c0_11, %c0_12] : memref<16x64xf32, #tpu.memory_space<vmem>>, vector<16x64xf32>
      tpu.vector_store %arg7[%c0_11, %c0_12], %13 {strides = array<i32>} : memref<16x64xf32, #tpu.memory_space<vmem>>, vector<16x64xf32>,
    } else {
    }
    %c0 = arith.constant 0 : index
    %c0_1 = arith.constant 0 : index
    %3 = vector.load %arg7[%c0, %c0_1] : memref<16x64xf32, #tpu.memory_space<vmem>>, vector<16x64xf32>
    %c0_2 = arith.constant 0 : index
    %c0_3 = arith.constant 0 : index
    %4 = vector.load %arg3[%c0_2, %c0_3] : memref<16x32xf32, #tpu.memory_space<vmem>>, vector<16x32xf32>
    %5 = arith.truncf %4 : vector<16x32xf32> to vector<16x32xbf16>
    %c0_4 = arith.constant 0 : index
    %c0_5 = arith.constant 0 : index
    %6 = vector.load %arg4[%c0_4, %c0_5] : memref<32x64xbf16, #tpu.memory_space<vmem>>, vector<32x64xbf16>
    %cst = arith.constant dense<0.000000e+00> : vector<16x64xf32>
    %7 = tpu.matmul %5, %6, %cst {dimension_numbers = #tpu.dot_dimension_numbers<[1], [0], [0], [1], [0, 0, 1, 1], [], []>} : vector<16x32xbf16>, vector<32x64xbf16>, vector<16x64xf32> -> vector<16x64xf32>
    %8 = arith.addf %3, %7 : vector<16x64xf32>
    %c0_6 = arith.constant 0 : index
    %c0_7 = arith.constant 0 : index
    %9 = vector.load %arg7[%c0_6, %c0_7] : memref<16x64xf32, #tpu.memory_space<vmem>>, vector<16x64xf32>
    tpu.vector_store %arg7[%c0_6, %c0_7], %8 {strides = array<i32>} : memref<16x64xf32, #tpu.memory_space<vmem>>, vector<16x64xf32>,
    %c0_i32_8 = arith.constant 0 : i32
    %10 = arith.cmpi eq, %arg2, %c0_i32_8 : i32
    %11 = arith.extui %10 : i1 to i32
    %c0_i32_9 = arith.constant 0 : i32
    %12 = arith.cmpi ne, %11, %c0_i32_9 : i32
    scf.if %12 {
      %c0_10 = arith.constant 0 : index
      %c0_11 = arith.constant 0 : index
      %13 = vector.load %arg7[%c0_10, %c0_11] : memref<16x64xf32, #tpu.memory_space<vmem>>, vector<16x64xf32>
      %c0_12 = arith.constant 0 : index
      %c0_13 = arith.constant 0 : index
      %14 = vector.load %arg5[%c0_12, %c0_13] : memref<1x64xf32, #tpu.memory_space<vmem>>, vector<1x64xf32>
      %15 = vector.broadcast %14 : vector<1x64xf32> to vector<16x64xf32>
      %16 = arith.addf %13, %15 : vector<16x64xf32>
      %17 = arith.truncf %16 : vector<16x64xf32> to vector<16x64xbf16>
      %c0_14 = arith.constant 0 : index
      %c0_15 = arith.constant 0 : index
      %18 = vector.load %arg6[%c0_14, %c0_15] : memref<16x64xbf16, #tpu.memory_space<vmem>>, vector<16x64xbf16>
      tpu.vector_store %arg6[%c0_14, %c0_15], %17 {strides = array<i32>} : memref<16x64xbf16, #tpu.memory_space<vmem>>, vector<16x64xbf16>,
    } else {
    }
    return
  }
  func.func @transform_0(%arg0: i32, %arg1: i32, %arg2: i32) -> (i32, i32) {
    %c0_i32 = arith.constant 0 : i32
    return %arg0, %arg2 : i32, i32
  }
  func.func @transform_1(%arg0: i32, %arg1: i32, %arg2: i32) -> (i32, i32) {
    %c0_i32 = arith.constant 0 : i32
    return %arg2, %arg1 : i32, i32
  }
  func.func @transform_2(%arg0: i32, %arg1: i32, %arg2: i32) -> (i32, i32) {
    %c0_i32 = arith.constant 0 : i32
    %c0_i32_0 = arith.constant 0 : i32
    return %c0_i32, %arg1 : i32, i32
  }
  func.func @transform_3(%arg0: i32, %arg1: i32, %arg2: i32) -> (i32, i32) {
    %c0_i32 = arith.constant 0 : i32
    return %arg0, %arg1 : i32, i32
  }
}

module attributes {stable_mosaic.version = 11 : i64} {
  func.func @_attn_kernel(%arg0: i32, %arg1: i32, %arg2: memref<1x8x32xbf16, #tpu.memory_space<vmem>>, %arg3: memref<1x8x64xbf16, #tpu.memory_space<vmem>>, %arg4: memref<1x8x8xi8, #tpu.memory_space<vmem>>, %arg5: memref<1x8x32xf32, #tpu.memory_space<vmem>>) attributes {dimension_semantics = [#tpu.dimension_semantics<parallel>, #tpu.dimension_semantics<parallel>], iteration_bounds = array<i64: 2, 1>, scalar_prefetch = 0 : i64, scratch_operands = 0 : i64, tpu.core_type = #tpu.core_type<tc>, window_params = [{transform_indices = @transform_0, window_bounds = array<i64: 1, 8, 32>}, {transform_indices = @transform_1, window_bounds = array<i64: 1, 8, 64>}, {transform_indices = @transform_2, window_bounds = array<i64: 1, 8, 8>}, {transform_indices = @transform_3, window_bounds = array<i64: 1, 8, 32>}]} {
    %c0 = arith.constant 0 : index
    %c0_0 = arith.constant 0 : index
    %c0_1 = arith.constant 0 : index
    %0 = vector.load %arg2[%c0, %c0_0, %c0_1] : memref<1x8x32xbf16, #tpu.memory_space<vmem>>, vector<1x8x32xbf16>
    %1 = vector.shape_cast %0 : vector<1x8x32xbf16> to vector<8x32xbf16>
    %2 = arith.extf %1 : vector<8x32xbf16> to vector<8x32xf32>
    %cst = arith.constant 0.353553385 : f32
    %3 = vector.broadcast %cst : f32 to vector<8x32xf32>
    %4 = arith.mulf %2, %3 : vector<8x32xf32>
    %c0_2 = arith.constant 0 : index
    %c0_3 = arith.constant 0 : index
    %c0_4 = arith.constant 0 : index
    %5 = vector.load %arg3[%c0_2, %c0_3, %c0_4] : memref<1x8x64xbf16, #tpu.memory_space<vmem>>, vector<1x8x64xbf16>
    %6 = vector.shape_cast %5 : vector<1x8x64xbf16> to vector<8x64xbf16>
    %c0_5 = arith.constant 0 : index
    %c0_6 = arith.constant 0 : index
    %c0_7 = arith.constant 0 : index
    %7 = vector.load %arg4[%c0_5, %c0_6, %c0_7] : memref<1x8x8xi8, #tpu.memory_space<vmem>>, vector<1x8x8xi8>
    %8 = vector.shape_cast %7 : vector<1x8x8xi8> to vector<8x8xi8>
    %c0_i8 = arith.constant 0 : i8
    %9 = vector.broadcast %c0_i8 : i8 to vector<8x8xi8>
    %10 = arith.cmpi ne, %8, %9 : vector<8x8xi8>
    %11 = vector.extract_strided_slice %4 {offsets = [0, 0], sizes = [8, 8], strides = [1, 1]} : vector<8x32xf32> to vector<8x8xf32>
    %12 = arith.truncf %11 : vector<8x8xf32> to vector<8x8xbf16>
    %13 = vector.extract_strided_slice %6 {offsets = [0, 0], sizes = [8, 8], strides = [1, 1]} : vector<8x64xbf16> to vector<8x8xbf16>
    %14 = vector.extract_strided_slice %6 {offsets = [0, 32], sizes = [8, 8], strides = [1, 1]} : vector<8x64xbf16> to vector<8x8xbf16>
    %cst_8 = arith.constant dense<0.000000e+00> : vector<8x8xf32>
    %15 = tpu.matmul %12, %13, %cst_8 {dimension_numbers = #tpu.dot_dimension_numbers<[1], [1], [0], [0], [0, 0, 1, 0], [], []>} : vector<8x8xbf16>, vector<8x8xbf16>, vector<8x8xf32> -> vector<8x8xf32>
    %cst_9 = arith.constant -1.000000e+09 : f32
    %16 = vector.broadcast %cst_9 : f32 to vector<8x8xf32>
    %17 = arith.select %10, %16, %15 : vector<8x8xi1>, vector<8x8xf32>
    %cst_10 = arith.constant dense<0xFF800000> : vector<8xf32>
    %18 = vector.multi_reduction <maximumf>, %17, %cst_10 [1] : vector<8x8xf32> to vector<8xf32>
    %19 = vector.shape_cast %18 : vector<8xf32> to vector<8x1xf32>
    %20 = vector.broadcast %19 : vector<8x1xf32> to vector<8x8xf32>
    %21 = arith.subf %17, %20 : vector<8x8xf32>
    %22 = math.exp %21 : vector<8x8xf32>
    %cst_11 = arith.constant dense<0.000000e+00> : vector<8xf32>
    %23 = vector.multi_reduction <add>, %22, %cst_11 [1] : vector<8x8xf32> to vector<8xf32>
    %24 = vector.shape_cast %23 : vector<8xf32> to vector<8x1xf32>
    %25 = tpu.reciprocal %24 {approx = true} : vector<8x1xf32> -> vector<8x1xf32>
    %26 = vector.broadcast %25 : vector<8x1xf32> to vector<8x8xf32>
    %27 = arith.mulf %22, %26 : vector<8x8xf32>
    %28 = arith.truncf %27 : vector<8x8xf32> to vector<8x8xbf16>
    %cst_12 = arith.constant dense<0.000000e+00> : vector<8x8xf32>
    %29 = tpu.matmul %28, %14, %cst_12 {dimension_numbers = #tpu.dot_dimension_numbers<[1], [0], [0], [1], [0, 0, 1, 1], [], []>} : vector<8x8xbf16>, vector<8x8xbf16>, vector<8x8xf32> -> vector<8x8xf32>
    %c0_13 = arith.constant 0 : index
    %c0_14 = arith.constant 0 : index
    %c0_15 = arith.constant 0 : index
    %30 = vector.load %arg5[%c0_13, %c0_14, %c0_15] : memref<1x8x32xf32, #tpu.memory_space<vmem>>, vector<1x8x8xf32>
    %31 = vector.shape_cast %30 : vector<1x8x8xf32> to vector<8x8xf32>
    %32 = vector.shape_cast %29 : vector<8x8xf32> to vector<1x8x8xf32>
    tpu.vector_store %arg5[%c0_13, %c0_14, %c0_15], %32 {strides = array<i32>} : memref<1x8x32xf32, #tpu.memory_space<vmem>>, vector<1x8x8xf32>,
    %33 = vector.extract_strided_slice %4 {offsets = [0, 8], sizes = [8, 8], strides = [1, 1]} : vector<8x32xf32> to vector<8x8xf32>
    %34 = arith.truncf %33 : vector<8x8xf32> to vector<8x8xbf16>
    %35 = vector.extract_strided_slice %6 {offsets = [0, 8], sizes = [8, 8], strides = [1, 1]} : vector<8x64xbf16> to vector<8x8xbf16>
    %36 = vector.extract_strided_slice %6 {offsets = [0, 40], sizes = [8, 8], strides = [1, 1]} : vector<8x64xbf16> to vector<8x8xbf16>
    %cst_16 = arith.constant dense<0.000000e+00> : vector<8x8xf32>
    %37 = tpu.matmul %34, %35, %cst_16 {dimension_numbers = #tpu.dot_dimension_numbers<[1], [1], [0], [0], [0, 0, 1, 0], [], []>} : vector<8x8xbf16>, vector<8x8xbf16>, vector<8x8xf32> -> vector<8x8xf32>
    %cst_17 = arith.constant -1.000000e+09 : f32
    %38 = vector.broadcast %cst_17 : f32 to vector<8x8xf32>
    %39 = arith.select %10, %38, %37 : vector<8x8xi1>, vector<8x8xf32>
    %cst_18 = arith.constant dense<0xFF800000> : vector<8xf32>
    %40 = vector.multi_reduction <maximumf>, %39, %cst_18 [1] : vector<8x8xf32> to vector<8xf32>
    %41 = vector.shape_cast %40 : vector<8xf32> to vector<8x1xf32>
    %42 = vector.broadcast %41 : vector<8x1xf32> to vector<8x8xf32>
    %43 = arith.subf %39, %42 : vector<8x8xf32>
    %44 = math.exp %43 : vector<8x8xf32>
    %cst_19 = arith.constant dense<0.000000e+00> : vector<8xf32>
    %45 = vector.multi_reduction <add>, %44, %cst_19 [1] : vector<8x8xf32> to vector<8xf32>
    %46 = vector.shape_cast %45 : vector<8xf32> to vector<8x1xf32>
    %47 = tpu.reciprocal %46 {approx = true} : vector<8x1xf32> -> vector<8x1xf32>
    %48 = vector.broadcast %47 : vector<8x1xf32> to vector<8x8xf32>
    %49 = arith.mulf %44, %48 : vector<8x8xf32>
    %50 = arith.truncf %49 : vector<8x8xf32> to vector<8x8xbf16>
    %cst_20 = arith.constant dense<0.000000e+00> : vector<8x8xf32>
    %51 = tpu.matmul %50, %36, %cst_20 {dimension_numbers = #tpu.dot_dimension_numbers<[1], [0], [0], [1], [0, 0, 1, 1], [], []>} : vector<8x8xbf16>, vector<8x8xbf16>, vector<8x8xf32> -> vector<8x8xf32>
    %c0_21 = arith.constant 0 : index
    %c0_22 = arith.constant 0 : index
    %c8 = arith.constant 8 : index
    %52 = vector.load %arg5[%c0_21, %c0_22, %c8] : memref<1x8x32xf32, #tpu.memory_space<vmem>>, vector<1x8x8xf32>
    %53 = vector.shape_cast %52 : vector<1x8x8xf32> to vector<8x8xf32>
    %54 = vector.shape_cast %51 : vector<8x8xf32> to vector<1x8x8xf32>
    tpu.vector_store %arg5[%c0_21, %c0_22, %c8], %54 {strides = array<i32>} : memref<1x8x32xf32, #tpu.memory_space<vmem>>, vector<1x8x8xf32>,
    %55 = vector.extract_strided_slice %4 {offsets = [0, 16], sizes = [8, 8], strides = [1, 1]} : vector<8x32xf32> to vector<8x8xf32>
    %56 = arith.truncf %55 : vector<8x8xf32> to vector<8x8xbf16>
    %57 = vector.extract_strided_slice %6 {offsets = [0, 16], sizes = [8, 8], strides = [1, 1]} : vector<8x64xbf16> to vector<8x8xbf16>
    %58 = vector.extract_strided_slice %6 {offsets = [0, 48], sizes = [8, 8], strides = [1, 1]} : vector<8x64xbf16> to vector<8x8xbf16>
    %cst_23 = arith.constant dense<0.000000e+00> : vector<8x8xf32>
    %59 = tpu.matmul %56, %57, %cst_23 {dimension_numbers = #tpu.dot_dimension_numbers<[1], [1], [0], [0], [0, 0, 1, 0], [], []>} : vector<8x8xbf16>, vector<8x8xbf16>, vector<8x8xf32> -> vector<8x8xf32>
    %cst_24 = arith.constant -1.000000e+09 : f32
    %60 = vector.broadcast %cst_24 : f32 to vector<8x8xf32>
    %61 = arith.select %10, %60, %59 : vector<8x8xi1>, vector<8x8xf32>
    %cst_25 = arith.constant dense<0xFF800000> : vector<8xf32>
    %62 = vector.multi_reduction <maximumf>, %61, %cst_25 [1] : vector<8x8xf32> to vector<8xf32>
    %63 = vector.shape_cast %62 : vector<8xf32> to vector<8x1xf32>
    %64 = vector.broadcast %63 : vector<8x1xf32> to vector<8x8xf32>
    %65 = arith.subf %61, %64 : vector<8x8xf32>
    %66 = math.exp %65 : vector<8x8xf32>
    %cst_26 = arith.constant dense<0.000000e+00> : vector<8xf32>
    %67 = vector.multi_reduction <add>, %66, %cst_26 [1] : vector<8x8xf32> to vector<8xf32>
    %68 = vector.shape_cast %67 : vector<8xf32> to vector<8x1xf32>
    %69 = tpu.reciprocal %68 {approx = true} : vector<8x1xf32> -> vector<8x1xf32>
    %70 = vector.broadcast %69 : vector<8x1xf32> to vector<8x8xf32>
    %71 = arith.mulf %66, %70 : vector<8x8xf32>
    %72 = arith.truncf %71 : vector<8x8xf32> to vector<8x8xbf16>
    %cst_27 = arith.constant dense<0.000000e+00> : vector<8x8xf32>
    %73 = tpu.matmul %72, %58, %cst_27 {dimension_numbers = #tpu.dot_dimension_numbers<[1], [0], [0], [1], [0, 0, 1, 1], [], []>} : vector<8x8xbf16>, vector<8x8xbf16>, vector<8x8xf32> -> vector<8x8xf32>
    %c0_28 = arith.constant 0 : index
    %c0_29 = arith.constant 0 : index
    %c16 = arith.constant 16 : index
    %74 = vector.load %arg5[%c0_28, %c0_29, %c16] : memref<1x8x32xf32, #tpu.memory_space<vmem>>, vector<1x8x8xf32>
    %75 = vector.shape_cast %74 : vector<1x8x8xf32> to vector<8x8xf32>
    %76 = vector.shape_cast %73 : vector<8x8xf32> to vector<1x8x8xf32>
    tpu.vector_store %arg5[%c0_28, %c0_29, %c16], %76 {strides = array<i32>} : memref<1x8x32xf32, #tpu.memory_space<vmem>>, vector<1x8x8xf32>,
    %77 = vector.extract_strided_slice %4 {offsets = [0, 24], sizes = [8, 8], strides = [1, 1]} : vector<8x32xf32> to vector<8x8xf32>
    %78 = arith.truncf %77 : vector<8x8xf32> to vector<8x8xbf16>
    %79 = vector.extract_strided_slice %6 {offsets = [0, 24], sizes = [8, 8], strides = [1, 1]} : vector<8x64xbf16> to vector<8x8xbf16>
    %80 = vector.extract_strided_slice %6 {offsets = [0, 56], sizes = [8, 8], strides = [1, 1]} : vector<8x64xbf16> to vector<8x8xbf16>
    %cst_30 = arith.constant dense<0.000000e+00> : vector<8x8xf32>
    %81 = tpu.matmul %78, %79, %cst_30 {dimension_numbers = #tpu.dot_dimension_numbers<[1], [1], [0], [0], [0, 0, 1, 0], [], []>} : vector<8x8xbf16>, vector<8x8xbf16>, vector<8x8xf32> -> vector<8x8xf32>
    %cst_31 = arith.constant -1.000000e+09 : f32
    %82 = vector.broadcast %cst_31 : f32 to vector<8x8xf32>
    %83 = arith.select %10, %82, %81 : vector<8x8xi1>, vector<8x8xf32>
    %cst_32 = arith.constant dense<0xFF800000> : vector<8xf32>
    %84 = vector.multi_reduction <maximumf>, %83, %cst_32 [1] : vector<8x8xf32> to vector<8xf32>
    %85 = vector.shape_cast %84 : vector<8xf32> to vector<8x1xf32>
    %86 = vector.broadcast %85 : vector<8x1xf32> to vector<8x8xf32>
    %87 = arith.subf %83, %86 : vector<8x8xf32>
    %88 = math.exp %87 : vector<8x8xf32>
    %cst_33 = arith.constant dense<0.000000e+00> : vector<8xf32>
    %89 = vector.multi_reduction <add>, %88, %cst_33 [1] : vector<8x8xf32> to vector<8xf32>
    %90 = vector.shape_cast %89 : vector<8xf32> to vector<8x1xf32>
    %91 = tpu.reciprocal %90 {approx = true} : vector<8x1xf32> -> vector<8x1xf32>
    %92 = vector.broadcast %91 : vector<8x1xf32> to vector<8x8xf32>
    %93 = arith.mulf %88, %92 : vector<8x8xf32>
    %94 = arith.truncf %93 : vector<8x8xf32> to vector<8x8xbf16>
    %cst_34 = arith.constant dense<0.000000e+00> : vector<8x8xf32>
    %95 = tpu.matmul %94, %80, %cst_34 {dimension_numbers = #tpu.dot_dimension_numbers<[1], [0], [0], [1], [0, 0, 1, 1], [], []>} : vector<8x8xbf16>, vector<8x8xbf16>, vector<8x8xf32> -> vector<8x8xf32>
    %c0_35 = arith.constant 0 : index
    %c0_36 = arith.constant 0 : index
    %c24 = arith.constant 24 : index
    %96 = vector.load %arg5[%c0_35, %c0_36, %c24] : memref<1x8x32xf32, #tpu.memory_space<vmem>>, vector<1x8x8xf32>
    %97 = vector.shape_cast %96 : vector<1x8x8xf32> to vector<8x8xf32>
    %98 = vector.shape_cast %95 : vector<8x8xf32> to vector<1x8x8xf32>
    tpu.vector_store %arg5[%c0_35, %c0_36, %c24], %98 {strides = array<i32>} : memref<1x8x32xf32, #tpu.memory_space<vmem>>, vector<1x8x8xf32>,
    return
  }
  func.func @transform_0(%arg0: i32, %arg1: i32) -> (i32, i32, i32) {
    %c0_i32 = arith.constant 0 : i32
    %c0_i32_0 = arith.constant 0 : i32
    return %arg0, %arg1, %c0_i32 : i32, i32, i32
  }
  func.func @transform_1(%arg0: i32, %arg1: i32) -> (i32, i32, i32) {
    %c0_i32 = arith.constant 0 : i32
    %c0_i32_0 = arith.constant 0 : i32
    %c0_i32_1 = arith.constant 0 : i32
    return %arg0, %c0_i32, %c0_i32_0 : i32, i32, i32
  }
  func.func @transform_2(%arg0: i32, %arg1: i32) -> (i32, i32, i32) {
    %c0_i32 = arith.constant 0 : i32
    %c0_i32_0 = arith.constant 0 : i32
    return %arg0, %arg1, %c0_i32 : i32, i32, i32
  }
  func.func @transform_3(%arg0: i32, %arg1: i32) -> (i32, i32, i32) {
    %c0_i32 = arith.constant 0 : i32
    %c0_i32_0 = arith.constant 0 : i32
    return %arg0, %arg1, %c0_i32 : i32, i32, i32
  }
}

module attributes {stable_mosaic.version = 11 : i64} {
  func.func @_matmul_kernel(%arg0: i32, %arg1: i32, %arg2: i32, %arg3: memref<16x32xf32, #tpu.memory_space<vmem>>, %arg4: memref<32x64xbf16, #tpu.memory_space<vmem>>, %arg5: memref<1x64xf32, #tpu.memory_space<vmem>>, %arg6: memref<16x64xbf16, #tpu.memory_space<vmem>>, %arg7: memref<16x64xf32, #tpu.memory_space<vmem>>) attributes {dimension_semantics = [#tpu.dimension_semantics<parallel>, #tpu.dimension_semantics<parallel>, #tpu.dimension_semantics<arbitrary>], iteration_bounds = array<i64: 1, 1, 1>, scalar_prefetch = 0 : i64, scratch_operands = 1 : i64, tpu.core_type = #tpu.core_type<tc>, window_params = [{transform_indices = @transform_0, window_bounds = array<i64: 16, 32>}, {transform_indices = @transform_1, window_bounds = array<i64: 32, 64>}, {transform_indices = @transform_2, window_bounds = array<i64: 1, 64>}, {transform_indices = @transform_3, window_bounds = array<i64: 16, 64>}]} {
    %c0_i32 = arith.constant 0 : i32
    %0 = arith.cmpi eq, %arg2, %c0_i32 : i32
    %1 = arith.extui %0 : i1 to i32
    %c0_i32_0 = arith.constant 0 : i32
    %2 = arith.cmpi ne, %1, %c0_i32_0 : i32
    scf.if %2 {
      %cst_10 = arith.constant 0.000000e+00 : f32
      %13 = vector.broadcast %cst_10 : f32 to vector<16x64xf32>
      %c0_11 = arith.constant 0 : index
      %c0_12 = arith.constant 0 : index
      %14 = vector.load %arg7[%c0_11, %c0_12] : memref<16x64xf32, #tpu.memory_space<vmem>>, vector<16x64xf32>
      tpu.vector_store %arg7[%c0_11, %c0_12], %13 {strides = array<i32>} : memref<16x64xf32, #tpu.memory_space<vmem>>, vector<16x64xf32>,
    } else {
    }
    %c0 = arith.constant 0 : index
    %c0_1 = arith.constant 0 : index
    %3 = vector.load %arg7[%c0, %c0_1] : memref<16x64xf32, #tpu.memory_space<vmem>>, vector<16x64xf32>
    %c0_2 = arith.constant 0 : index
    %c0_3 = arith.constant 0 : index
    %4 = vector.load %arg3[%c0_2, %c0_3] : memref<16x32xf32, #tpu.memory_space<vmem>>, vector<16x32xf32>
    %5 = arith.truncf %4 : vector<16x32xf32> to vector<16x32xbf16>
    %c0_4 = arith.constant 0 : index
    %c0_5 = arith.constant 0 : index
    %6 = vector.load %arg4[%c0_4, %c0_5] : memref<32x64xbf16, #tpu.memory_space<vmem>>, vector<32x64xbf16>
    %cst = arith.constant dense<0.000000e+00> : vector<16x64xf32>
    %7 = tpu.matmul %5, %6, %cst {dimension_numbers = #tpu.dot_dimension_numbers<[1], [0], [0], [1], [0, 0, 1, 1], [], []>} : vector<16x32xbf16>, vector<32x64xbf16>, vector<16x64xf32> -> vector<16x64xf32>
    %8 = arith.addf %3, %7 : vector<16x64xf32>
    %c0_6 = arith.constant 0 : index
    %c0_7 = arith.constant 0 : index
    %9 = vector.load %arg7[%c0_6, %c0_7] : memref<16x64xf32, #tpu.memory_space<vmem>>, vector<16x64xf32>
    tpu.vector_store %arg7[%c0_6, %c0_7], %8 {strides = array<i32>} : memref<16x64xf32, #tpu.memory_space<vmem>>, vector<16x64xf32>,
    %c0_i32_8 = arith.constant 0 : i32
    %10 = arith.cmpi eq, %arg2, %c0_i32_8 : i32
    %11 = arith.extui %10 : i1 to i32
    %c0_i32_9 = arith.constant 0 : i32
    %12 = arith.cmpi ne, %11, %c0_i32_9 : i32
    scf.if %12 {
      %c0_10 = arith.constant 0 : index
      %c0_11 = arith.constant 0 : index
      %13 = vector.load %arg7[%c0_10, %c0_11] : memref<16x64xf32, #tpu.memory_space<vmem>>, vector<16x64xf32>
      %c0_12 = arith.constant 0 : index
      %c0_13 = arith.constant 0 : index
      %14 = vector.load %arg5[%c0_12, %c0_13] : memref<1x64xf32, #tpu.memory_space<vmem>>, vector<1x64xf32>
      %15 = vector.broadcast %14 : vector<1x64xf32> to vector<16x64xf32>
      %16 = arith.addf %13, %15 : vector<16x64xf32>
      %cst_14 = arith.constant 0.000000e+00 : f32
      %17 = vector.broadcast %cst_14 : f32 to vector<16x64xf32>
      %18 = arith.maximumf %16, %17 : vector<16x64xf32>
      %19 = arith.truncf %18 : vector<16x64xf32> to vector<16x64xbf16>
      %c0_15 = arith.constant 0 : index
      %c0_16 = arith.constant 0 : index
      %20 = vector.load %arg6[%c0_15, %c0_16] : memref<16x64xbf16, #tpu.memory_space<vmem>>, vector<16x64xbf16>
      tpu.vector_store %arg6[%c0_15, %c0_16], %19 {strides = array<i32>} : memref<16x64xbf16, #tpu.memory_space<vmem>>, vector<16x64xbf16>,
    } else {
    }
    return
  }
  func.func @transform_0(%arg0: i32, %arg1: i32, %arg2: i32) -> (i32, i32) {
    %c0_i32 = arith.constant 0 : i32
    return %arg0, %arg2 : i32, i32
  }
  func.func @transform_1(%arg0: i32, %arg1: i32, %arg2: i32) -> (i32, i32) {
    %c0_i32 = arith.constant 0 : i32
    return %arg2, %arg1 : i32, i32
  }
  func.func @transform_2(%arg0: i32, %arg1: i32, %arg2: i32) -> (i32, i32) {
    %c0_i32 = arith.constant 0 : i32
    %c0_i32_0 = arith.constant 0 : i32
    return %c0_i32, %arg1 : i32, i32
  }
  func.func @transform_3(%arg0: i32, %arg1: i32, %arg2: i32) -> (i32, i32) {
    %c0_i32 = arith.constant 0 : i32
    return %arg0, %arg1 : i32, i32
  }
}

module attributes {stable_mosaic.version = 11 : i64} {
  func.func @_matmul_addln_kernel(%arg0: i32, %arg1: i32, %arg2: memref<16x64xbf16, #tpu.memory_space<vmem>>, %arg3: memref<64x32xbf16, #tpu.memory_space<vmem>>, %arg4: memref<1x32xf32, #tpu.memory_space<vmem>>, %arg5: memref<16x32xf32, #tpu.memory_space<vmem>>, %arg6: memref<1x32xf32, #tpu.memory_space<vmem>>, %arg7: memref<1x32xf32, #tpu.memory_space<vmem>>, %arg8: memref<16x32xf32, #tpu.memory_space<vmem>>, %arg9: memref<16x32xf32, #tpu.memory_space<vmem>>) attributes {dimension_semantics = [#tpu.dimension_semantics<parallel>, #tpu.dimension_semantics<arbitrary>], iteration_bounds = array<i64: 1, 1>, scalar_prefetch = 0 : i64, scratch_operands = 1 : i64, tpu.core_type = #tpu.core_type<tc>, window_params = [{transform_indices = @transform_0, window_bounds = array<i64: 16, 64>}, {transform_indices = @transform_1, window_bounds = array<i64: 64, 32>}, {pipeline_mode = #tpu.pipeline_mode<synchronous>, transform_indices = @transform_2, window_bounds = array<i64: 1, 32>}, {transform_indices = @transform_3, window_bounds = array<i64: 16, 32>}, {pipeline_mode = #tpu.pipeline_mode<synchronous>, transform_indices = @transform_4, window_bounds = array<i64: 1, 32>}, {pipeline_mode = #tpu.pipeline_mode<synchronous>, transform_indices = @transform_5, window_bounds = array<i64: 1, 32>}, {transform_indices = @transform_6, window_bounds = array<i64: 16, 32>}]} {
    %c0_i32 = arith.constant 0 : i32
    %0 = arith.cmpi eq, %arg1, %c0_i32 : i32
    %1 = arith.extui %0 : i1 to i32
    %c0_i32_0 = arith.constant 0 : i32
    %2 = arith.cmpi ne, %1, %c0_i32_0 : i32
    scf.if %2 {
      %cst_10 = arith.constant 0.000000e+00 : f32
      %12 = vector.broadcast %cst_10 : f32 to vector<16x32xf32>
      %c0_11 = arith.constant 0 : index
      %c0_12 = arith.constant 0 : index
      %13 = vector.load %arg9[%c0_11, %c0_12] : memref<16x32xf32, #tpu.memory_space<vmem>>, vector<16x32xf32>
      tpu.vector_store %arg9[%c0_11, %c0_12], %12 {strides = array<i32>} : memref<16x32xf32, #tpu.memory_space<vmem>>, vector<16x32xf32>,
    } else {
    }
    %c0 = arith.constant 0 : index
    %c0_1 = arith.constant 0 : index
    %3 = vector.load %arg9[%c0, %c0_1] : memref<16x32xf32, #tpu.memory_space<vmem>>, vector<16x32xf32>
    %c0_2 = arith.constant 0 : index
    %c0_3 = arith.constant 0 : index
    %4 = vector.load %arg2[%c0_2, %c0_3] : memref<16x64xbf16, #tpu.memory_space<vmem>>, vector<16x64xbf16>
    %c0_4 = arith.constant 0 : index
    %c0_5 = arith.constant 0 : index
    %5 = vector.load %arg3[%c0_4, %c0_5] : memref<64x32xbf16, #tpu.memory_space<vmem>>, vector<64x32xbf16>
    %cst = arith.constant dense<0.000000e+00> : vector<16x32xf32>
    %6 = tpu.matmul %4, %5, %cst {dimension_numbers = #tpu.dot_dimension_numbers<[1], [0], [0], [1], [0, 0, 1, 1], [], []>} : vector<16x64xbf16>, vector<64x32xbf16>, vector<16x32xf32> -> vector<16x32xf32>
    %7 = arith.addf %3, %6 : vector<16x32xf32>
    %c0_6 = arith.constant 0 : index
    %c0_7 = arith.constant 0 : index
    %8 = vector.load %arg9[%c0_6, %c0_7] : memref<16x32xf32, #tpu.memory_space<vmem>>, vector<16x32xf32>
    tpu.vector_store %arg9[%c0_6, %c0_7], %7 {strides = array<i32>} : memref<16x32xf32, #tpu.memory_space<vmem>>, vector<16x32xf32>,
    %c0_i32_8 = arith.constant 0 : i32
    %9 = arith.cmpi eq, %arg1, %c0_i32_8 : i32
    %10 = arith.extui %9 : i1 to i32
    %c0_i32_9 = arith.constant 0 : i32
    %11 = arith.cmpi ne, %10, %c0_i32_9 : i32
    scf.if %11 {
      %c0_10 = arith.constant 0 : index
      %c0_11 = arith.constant 0 : index
      %12 = vector.load %arg9[%c0_10, %c0_11] : memref<16x32xf32, #tpu.memory_space<vmem>>, vector<16x32xf32>
      %c0_12 = arith.constant 0 : index
      %c0_13 = arith.constant 0 : index
      %13 = vector.load %arg4[%c0_12, %c0_13] : memref<1x32xf32, #tpu.memory_space<vmem>>, vector<1x32xf32>
      %14 = vector.broadcast %13 : vector<1x32xf32> to vector<16x32xf32>
      %15 = arith.addf %12, %14 : vector<16x32xf32>
      %c0_14 = arith.constant 0 : index
      %c0_15 = arith.constant 0 : index
      %16 = vector.load %arg5[%c0_14, %c0_15] : memref<16x32xf32, #tpu.memory_space<vmem>>, vector<16x32xf32>
      %17 = arith.addf %15, %16 : vector<16x32xf32>
      %cst_16 = arith.constant dense<0.000000e+00> : vector<16xf32>
      %18 = vector.multi_reduction <add>, %17, %cst_16 [1] : vector<16x32xf32> to vector<16xf32>
      %19 = vector.shape_cast %18 : vector<16xf32> to vector<16x1xf32>
      %cst_17 = arith.constant 3.200000e+01 : f32
      %20 = vector.broadcast %cst_17 : f32 to vector<16x1xf32>
      %21 = arith.divf %19, %20 : vector<16x1xf32>
      %22 = vector.broadcast %21 : vector<16x1xf32> to vector<16x32xf32>
      %23 = arith.subf %17, %22 : vector<16x32xf32>
      %24 = arith.mulf %23, %23 : vector<16x32xf32>
      %cst_18 = arith.constant dense<0.000000e+00> : vector<16xf32>
      %25 = vector.multi_reduction <add>, %24, %cst_18 [1] : vector<16x32xf32> to vector<16xf32>
      %26 = vector.shape_cast %25 : vector<16xf32> to vector<16x1xf32>
      %cst_19 = arith.constant 3.200000e+01 : f32
      %27 = vector.broadcast %cst_19 : f32 to vector<16x1xf32>
      %28 = arith.divf %26, %27 : vector<16x1xf32>
      %29 = vector.broadcast %21 : vector<16x1xf32> to vector<16x32xf32>
      %30 = arith.subf %17, %29 : vector<16x32xf32>
      %cst_20 = arith.constant 9.99999996E-13 : f32
      %31 = vector.broadcast %cst_20 : f32 to vector<16x1xf32>
      %32 = arith.addf %28, %31 : vector<16x1xf32>
      %33 = math.rsqrt %32 : vector<16x1xf32>
      %34 = vector.broadcast %33 : vector<16x1xf32> to vector<16x32xf32>
      %35 = arith.mulf %30, %34 : vector<16x32xf32>
      %c0_21 = arith.constant 0 : index
      %c0_22 = arith.constant 0 : index
      %36 = vector.load %arg6[%c0_21, %c0_22] : memref<1x32xf32, #tpu.memory_space<vmem>>, vector<1x32xf32>
      %37 = vector.broadcast %36 : vector<1x32xf32> to vector<16x32xf32>
      %38 = arith.mulf %35, %37 : vector<16x32xf32>
      %c0_23 = arith.constant 0 : index
      %c0_24 = arith.constant 0 : index
      %39 = vector.load %arg7[%c0_23, %c0_24] : memref<1x32xf32, #tpu.memory_space<vmem>>, vector<1x32xf32>
      %40 = vector.broadcast %39 : vector<1x32xf32> to vector<16x32xf32>
      %41 = arith.addf %38, %40 : vector<16x32xf32>
      %c0_25 = arith.constant 0 : index
      %c0_26 = arith.constant 0 : index
      %42 = vector.load %arg8[%c0_25, %c0_26] : memref<16x32xf32, #tpu.memory_space<vmem>>, vector<16x32xf32>
      tpu.vector_store %arg8[%c0_25, %c0_26], %41 {strides = array<i32>} : memref<16x32xf32, #tpu.memory_space<vmem>>, vector<16x32xf32>,
    } else {
    }
    return
  }
  func.func @transform_0(%arg0: i32, %arg1: i32) -> (i32, i32) {
    %c0_i32 = arith.constant 0 : i32
    return %arg0, %arg1 : i32, i32
  }
  func.func @transform_1(%arg0: i32, %arg1: i32) -> (i32, i32) {
    %c0_i32 = arith.constant 0 : i32
    %c0_i32_0 = arith.constant 0 : i32
    return %arg1, %c0_i32 : i32, i32
  }
  func.func @transform_2(%arg0: i32, %arg1: i32) -> (i32, i32) {
    %c0_i32 = arith.constant 0 : i32
    %c0_i32_0 = arith.constant 0 : i32
    %c0_i32_1 = arith.constant 0 : i32
    return %c0_i32, %c0_i32_0 : i32, i32
  }
  func.func @transform_3(%arg0: i32, %arg1: i32) -> (i32, i32) {
    %c0_i32 = arith.constant 0 : i32
    %c0_i32_0 = arith.constant 0 : i32
    return %arg0, %c0_i32 : i32, i32
  }
  func.func @transform_4(%arg0: i32, %arg1: i32) -> (i32, i32) {
    %c0_i32 = arith.constant 0 : i32
    %c0_i32_0 = arith.constant 0 : i32
    %c0_i32_1 = arith.constant 0 : i32
    return %c0_i32, %c0_i32_0 : i32, i32
  }
  func.func @transform_5(%arg0: i32, %arg1: i32) -> (i32, i32) {
    %c0_i32 = arith.constant 0 : i32
    %c0_i32_0 = arith.constant 0 : i32
    %c0_i32_1 = arith.constant 0 : i32
    return %c0_i32, %c0_i32_0 : i32, i32
  }
  func.func @transform_6(%arg0: i32, %arg1: i32) -> (i32, i32) {
    %c0_i32 = arith.constant 0 : i32
    %c0_i32_0 = arith.constant 0 : i32
    return %arg0, %c0_i32 : i32, i32
  }
}

module attributes {stable_mosaic.version = 11 : i64} {
  func.func @_matmul_kernel(%arg0: i32, %arg1: i32, %arg2: i32, %arg3: memref<16x32xf32, #tpu.memory_space<vmem>>, %arg4: memref<32x50xbf16, #tpu.memory_space<vmem>>, %arg5: memref<1x50xf32, #tpu.memory_space<vmem>>, %arg6: memref<16x50xf32, #tpu.memory_space<vmem>>, %arg7: memref<16x50xf32, #tpu.memory_space<vmem>>) attributes {dimension_semantics = [#tpu.dimension_semantics<parallel>, #tpu.dimension_semantics<parallel>, #tpu.dimension_semantics<arbitrary>], iteration_bounds = array<i64: 1, 1, 1>, scalar_prefetch = 0 : i64, scratch_operands = 1 : i64, tpu.core_type = #tpu.core_type<tc>, window_params = [{transform_indices = @transform_0, window_bounds = array<i64: 16, 32>}, {transform_indices = @transform_1, window_bounds = array<i64: 32, 50>}, {transform_indices = @transform_2, window_bounds = array<i64: 1, 50>}, {transform_indices = @transform_3, window_bounds = array<i64: 16, 50>}]} {
    %c0_i32 = arith.constant 0 : i32
    %0 = arith.cmpi eq, %arg2, %c0_i32 : i32
    %1 = arith.extui %0 : i1 to i32
    %c0_i32_0 = arith.constant 0 : i32
    %2 = arith.cmpi ne, %1, %c0_i32_0 : i32
    scf.if %2 {
      %cst_10 = arith.constant 0.000000e+00 : f32
      %13 = vector.broadcast %cst_10 : f32 to vector<16x50xf32>
      %c0_11 = arith.constant 0 : index
      %c0_12 = arith.constant 0 : index
      %14 = vector.load %arg7[%c0_11, %c0_12] : memref<16x50xf32, #tpu.memory_space<vmem>>, vector<16x50xf32>
      tpu.vector_store %arg7[%c0_11, %c0_12], %13 {strides = array<i32>} : memref<16x50xf32, #tpu.memory_space<vmem>>, vector<16x50xf32>,
    } else {
    }
    %c0 = arith.constant 0 : index
    %c0_1 = arith.constant 0 : index
    %3 = vector.load %arg7[%c0, %c0_1] : memref<16x50xf32, #tpu.memory_space<vmem>>, vector<16x50xf32>
    %c0_2 = arith.constant 0 : index
    %c0_3 = arith.constant 0 : index
    %4 = vector.load %arg3[%c0_2, %c0_3] : memref<16x32xf32, #tpu.memory_space<vmem>>, vector<16x32xf32>
    %5 = arith.truncf %4 : vector<16x32xf32> to vector<16x32xbf16>
    %c0_4 = arith.constant 0 : index
    %c0_5 = arith.constant 0 : index
    %6 = vector.load %arg4[%c0_4, %c0_5] : memref<32x50xbf16, #tpu.memory_space<vmem>>, vector<32x50xbf16>
    %cst = arith.constant dense<0.000000e+00> : vector<16x50xf32>
    %7 = tpu.matmul %5, %6, %cst {dimension_numbers = #tpu.dot_dimension_numbers<[1], [0], [0], [1], [0, 0, 1, 1], [], []>} : vector<16x32xbf16>, vector<32x50xbf16>, vector<16x50xf32> -> vector<16x50xf32>
    %8 = arith.addf %3, %7 : vector<16x50xf32>
    %c0_6 = arith.constant 0 : index
    %c0_7 = arith.constant 0 : index
    %9 = vector.load %arg7[%c0_6, %c0_7] : memref<16x50xf32, #tpu.memory_space<vmem>>, vector<16x50xf32>
    tpu.vector_store %arg7[%c0_6, %c0_7], %8 {strides = array<i32>} : memref<16x50xf32, #tpu.memory_space<vmem>>, vector<16x50xf32>,
    %c0_i32_8 = arith.constant 0 : i32
    %10 = arith.cmpi eq, %arg2, %c0_i32_8 : i32
    %11 = arith.extui %10 : i1 to i32
    %c0_i32_9 = arith.constant 0 : i32
    %12 = arith.cmpi ne, %11, %c0_i32_9 : i32
    scf.if %12 {
      %c0_10 = arith.constant 0 : index
      %c0_11 = arith.constant 0 : index
      %13 = vector.load %arg7[%c0_10, %c0_11] : memref<16x50xf32, #tpu.memory_space<vmem>>, vector<16x50xf32>
      %c0_12 = arith.constant 0 : index
      %c0_13 = arith.constant 0 : index
      %14 = vector.load %arg5[%c0_12, %c0_13] : memref<1x50xf32, #tpu.memory_space<vmem>>, vector<1x50xf32>
      %15 = vector.broadcast %14 : vector<1x50xf32> to vector<16x50xf32>
      %16 = arith.addf %13, %15 : vector<16x50xf32>
      %c0_14 = arith.constant 0 : index
      %c0_15 = arith.constant 0 : index
      %17 = vector.load %arg6[%c0_14, %c0_15] : memref<16x50xf32, #tpu.memory_space<vmem>>, vector<16x50xf32>
      tpu.vector_store %arg6[%c0_14, %c0_15], %16 {strides = array<i32>} : memref<16x50xf32, #tpu.memory_space<vmem>>, vector<16x50xf32>,
    } else {
    }
    return
  }
  func.func @transform_0(%arg0: i32, %arg1: i32, %arg2: i32) -> (i32, i32) {
    %c0_i32 = arith.constant 0 : i32
    return %arg0, %arg2 : i32, i32
  }
  func.func @transform_1(%arg0: i32, %arg1: i32, %arg2: i32) -> (i32, i32) {
    %c0_i32 = arith.constant 0 : i32
    return %arg2, %arg1 : i32, i32
  }
  func.func @transform_2(%arg0: i32, %arg1: i32, %arg2: i32) -> (i32, i32) {
    %c0_i32 = arith.constant 0 : i32
    %c0_i32_0 = arith.constant 0 : i32
    return %c0_i32, %arg1 : i32, i32
  }
  func.func @transform_3(%arg0: i32, %arg1: i32, %arg2: i32) -> (i32, i32) {
    %c0_i32 = arith.constant 0 : i32
    return %arg0, %arg1 : i32, i32
  }
}

</mosaic_0001>

<bundles_post_ra>
// kernel: decoder_forward.10
= control target key start
LH: loop header
LB: loop body
LE: loop exit
PB: predicated region body
PF: predicated region fallthrough
CT: control target
= control target key end

     0   :  { %vm19_vm0 = vcmask 785408   ;;  %v145_v0 = vmov 0.0   ;;  %vm146_vm1 = vmmov 0   ;;  %vm43_vm2 = vcmask 261120   ;;  %s192_s1 = inlined_call_operand.vmem [shape: bf16[32,96], index: 1, kind: input, shape index: {}]   ;;  %s193_s0 = inlined_call_operand.vmem [shape: f32[16,32], index: 0, kind: input, shape index: {}]   ;;  %s194_s2 = inlined_call_operand.vmem [shape: f32[1,96], index: 2, kind: input, shape index: {}]   ;;  %s195_s3 = inlined_call_operand.vmem [shape: bf16[16,96], index: 3, kind: output, shape index: {}]  }
   0x1   :  { %133 = vmatprep.subr.bf16.mxu0 %v145_v0  ;;  %v143_v1 = vld [vmem:[%s192_s1 + $0x8] sm:$0xff]   ;;  %137 = vmatprep.mubr.msk.bf16.mxu0 %vm146_vm1, %v145_v0  ;;  %20 = vst.msk [vmem:[#allocation2] sm:$0xff] %vm19_vm0, %v145_v0  ;;  %21 = vst.msk [vmem:[#allocation2 + $0x8] sm:$0xff] %vm19_vm0, %v145_v0  ;;  %v144_v2 = vld [vmem:[%s192_s1] sm:$0xff]   ;;  %vm115_vm3 = vcmask 781312  }
   0x2   :  { %134 = vmatpush3.bf16.msra.mxu0 %v143_v1  ;;  %v24_v3 = vld [vmem:[%s193_s0] sm:$0xff]  ;;  %v25_v4 = vld [vmem:[%s193_s0 + $0x8] sm:$0xff] }
   0x3   :  { %135 = vmatprep.subr.bf16.mxu0 %v145_v0  ;;  %v26_v5 = vpack.c.bf16 %v25_v4, %v24_v3  ;;  %v125_v14 = vld [vmem:[%s194_s2] ss:$0 sm:$0xff] }
   0x6   :  { %136 = vmatpush3.bf16.msra.mxu0 %v144_v2 }
   0x8   :  { %v22_v6 = vld [vmem:[#allocation2] sm:$0xff]  ;;  %v23_v10 = vld [vmem:[#allocation2 + $0x8] sm:$0xff] }
   0x9   :  { %138 = vmatmul.mubr.msk.bf16.vlgmr.msra.gmra.mxu0 %vm43_vm2, %v26_v5 }
  0xc9   :  { %v81_v7 = vpop.f32.mrf.mxu0 }
  0xca   :  { %v88_v8 = vadd.f32 %v81_v7, %v22_v6 }
  0xcb   :  { %v139_v9 = vpop.f32.mrf.mxu0 }
  0xcc   :  { %91 = vst.msk [vmem:[#allocation2] sm:$0xff] %vm19_vm0, %v88_v8 }
  0xcd   :  { %v84_v11 = vpop.f32.mrf.mxu0 }
  0xce   :  { %v89_v12 = vadd.f32 %v84_v11, %v23_v10 }
  0xcf   :  { %v140_v13 = vpop.f32.mrf.mxu0 }
  0xd0   :  { %92 = vst.msk [vmem:[#allocation2 + $0x8] sm:$0xff] %vm19_vm0, %v89_v12 }
  0xd3   :  { %v96_v15 = vld [vmem:[#allocation2] sm:$0xff] }
  0xd4   :  { %v105_v16 = vadd.f32 %v125_v14, %v96_v15 }
  0xd6   :  { %v128_v17 = vpack.c.bf16 %v105_v16, %v105_v16 }
  0xd7   :  { %v97_v18 = vld [vmem:[#allocation2 + $0x8] sm:$0xff] }
  0xd8   :  { %116 = vst.msk [vmem:[%s195_s3] sm:$0xf] %vm115_vm3, %v128_v17  ;;  %v106_v19 = vadd.f32 %v125_v14, %v97_v18 }
  0xda   :  { %v129_v20 = vpack.c.bf16 %v106_v19, %v106_v19 }
  0xdc   :  { %117 = vst.msk [vmem:[%s195_s3 + $0x4] sm:$0xf] %vm115_vm3, %v129_v20 }

// kernel: decoder_forward.12
= control target key start
LH: loop header
LB: loop body
LE: loop exit
PB: predicated region body
PF: predicated region fallthrough
CT: control target
= control target key end

     0   :  { %vm28_vm0 = vcmask 261120   ;;  %v195_v0 = vmov 0.0   ;;  %vm196_vm1 = vmmov 0   ;;  %s276_s1 = inlined_call_operand.vmem [shape: bf16[32,32], index: 1, kind: input, shape index: {}]   ;;  %s277_s0 = inlined_call_operand.vmem [shape: f32[16,32], index: 0, kind: input, shape index: {}]   ;;  %s278_s2 = inlined_call_operand.vmem [shape: f32[1,32], index: 2, kind: input, shape index: {}]   ;;  %s279_s3 = inlined_call_operand.vmem [shape: f32[16,32], index: 3, kind: input, shape index: {}]   ;;  %s280_s4 = inlined_call_operand.vmem [shape: f32[1,32], index: 4, kind: input, shape index: {}]   ;;  %s281_s5 = inlined_call_operand.vmem [shape: f32[1,32], index: 5, kind: input, shape index: {}]   ;;  %s282_s6 = inlined_call_operand.vmem [shape: f32[16,32], index: 6, kind: output, shape index: {}]  }
   0x1   :  { %179 = vmatprep.subr.bf16.mxu0 %v195_v0  ;;  %v189_v1 = vld [vmem:[%s276_s1 + $0x8] sm:$0xff]   ;;  %183 = vmatprep.mubr.msk.bf16.mxu0 %vm196_vm1, %v195_v0  ;;  %29 = vst.msk [vmem:[#allocation2] sm:$0xff] %vm28_vm0, %v195_v0  ;;  %30 = vst.msk [vmem:[#allocation2 + $0x8] sm:$0xff] %vm28_vm0, %v195_v0  ;;  %v190_v2 = vld [vmem:[%s276_s1] sm:$0xff]  }
   0x2   :  { %180 = vmatpush3.bf16.msra.mxu0 %v189_v1  ;;  %v33_v3 = vld [vmem:[%s277_s0] sm:$0xff]  ;;  %v34_v4 = vld [vmem:[%s277_s0 + $0x8] sm:$0xff] }
   0x3   :  { %181 = vmatprep.subr.bf16.mxu0 %v195_v0  ;;  %v35_v5 = vpack.c.bf16 %v34_v4, %v33_v3  ;;  %v173_v14 = vld [vmem:[%s278_s2] ss:$0 sm:$0xff]  ;;  %v116_v20 = vld [vmem:[%s279_s3 + $0x8] sm:$0xff] }
   0x4   :  { %v115_v16 = vld [vmem:[%s279_s3] sm:$0xff] }
   0x5   :  { %v174_v42 = vld [vmem:[%s280_s4] ss:$0 sm:$0xff] }
   0x6   :  { %182 = vmatpush3.bf16.msra.mxu0 %v190_v2  ;;  %v175_v44 = vld [vmem:[%s281_s5] ss:$0 sm:$0xff] }
   0x8   :  { %v31_v6 = vld [vmem:[#allocation2] sm:$0xff]  ;;  %v32_v10 = vld [vmem:[#allocation2 + $0x8] sm:$0xff] }
   0x9   :  { %184 = vmatmul.mubr.msk.bf16.vlgmr.msra.gmra.mxu0 %vm28_vm0, %v35_v5 }
  0xc9   :  { %v90_v7 = vpop.f32.mrf.mxu0 }
  0xca   :  { %v97_v8 = vadd.f32 %v90_v7, %v31_v6 }
  0xcb   :  { %v185_v9 = vpop.f32.mrf.mxu0 }
  0xcc   :  { %99 = vst.msk [vmem:[#allocation2] sm:$0xff] %vm28_vm0, %v97_v8 }
  0xcd   :  { %v93_v11 = vpop.f32.mrf.mxu0 }
  0xce   :  { %v98_v12 = vadd.f32 %v93_v11, %v32_v10 }
  0xcf   :  { %v186_v13 = vpop.f32.mrf.mxu0 }
  0xd0   :  { %100 = vst.msk [vmem:[#allocation2 + $0x8] sm:$0xff] %vm28_vm0, %v98_v12 }
  0xd3   :  { %v104_v15 = vld [vmem:[#allocation2] sm:$0xff] }
  0xd4   :  { %v113_v17 = vadd.f32 %v173_v14, %v104_v15 }
  0xd6   :  { %v117_v18 = vadd.f32 %v115_v16, %v113_v17 }
  0xd7   :  { %v105_v19 = vld [vmem:[#allocation2 + $0x8] sm:$0xff] }
  0xd8   :  { %v119_v21 = vsel %vm28_vm0, %v117_v18, 0.0  ;;  %v114_v22 = vadd.f32 %v173_v14, %v105_v19 }
  0xd9   :  { %120 = vadd.xlane.f32.xlu0 %v119_v21 }
  0xda   :  { %v118_v23 = vadd.f32 %v116_v20, %v114_v22 }
  0xdc   :  { %v122_v24 = vsel %vm28_vm0, %v118_v23, 0.0 }
  0xdd   :  { %123 = vadd.xlane.f32.xlu0 %v122_v24 }
 0x162   :  { %v121_v25 = vpop.xlane.xlu0 %120 }
 0x163   :  { %v126_v26 = vmul.f32 0.03125, %v121_v25 }
 0x165   :  { %v128_v27 = vsub.f32 %v117_v18, %v126_v26 }
 0x166   :  { %v124_v28 = vpop.xlane.xlu0 %123 }
 0x167   :  { %v127_v29 = vmul.f32 0.03125, %v124_v28  ;;  %v130_v30 = vmul.f32 %v128_v27, %v128_v27 }
 0x169   :  { %v129_v31 = vsub.f32 %v118_v23, %v127_v29  ;;  %v132_v32 = vsel %vm28_vm0, %v130_v30, 0.0 }
 0x16a   :  { %133 = vadd.xlane.f32.xlu1 %v132_v32 }
 0x16b   :  { %v131_v33 = vmul.f32 %v129_v31, %v129_v31 }
 0x16d   :  { %v135_v34 = vsel %vm28_vm0, %v131_v33, 0.0 }
 0x16e   :  { %136 = vadd.xlane.f32.xlu1 %v135_v34 }
 0x1f3   :  { %v134_v35 = vpop.xlane.xlu1 %133 }
 0x1f4   :  { %v138_v36 = vmul.f32 0.03125, %v134_v35 }
 0x1f6   :  { %v140_v37 = vadd.f32 1e-12, %v138_v36 }
 0x1f7   :  { %v137_v38 = vpop.xlane.xlu1 %136 }
 0x1f8   :  { %191 = vrsqrt.f32 %v140_v37  ;;  %v139_v39 = vmul.f32 0.03125, %v137_v38 }
 0x1fa   :  { %v141_v40 = vadd.f32 1e-12, %v139_v39 }
 0x1fc   :  { %193 = vrsqrt.f32 %v141_v40 }
 0x205   :  { %v192_v41 = vpop.eup %191 }
 0x206   :  { %v144_v43 = vmul.f32 %v192_v41, %v128_v27 }
 0x208   :  { %v153_v45 = vmul.f32 %v174_v42, %v144_v43 }
 0x209   :  { %v194_v46 = vpop.eup %193 }
 0x20a   :  { %v162_v47 = vadd.f32 %v175_v44, %v153_v45  ;;  %v145_v48 = vmul.f32 %v194_v46, %v129_v31 }
 0x20c   :  { %164 = vst.msk [vmem:[%s282_s6] sm:$0xff] %vm28_vm0, %v162_v47  ;;  %v154_v49 = vmul.f32 %v174_v42, %v145_v48 }
 0x20e   :  { %v163_v50 = vadd.f32 %v175_v44, %v154_v49 }
 0x210   :  { %165 = vst.msk [vmem:[%s282_s6 + $0x8] sm:$0xff] %vm28_vm0, %v163_v50 }

// kernel: decoder_forward.13
= control target key start
LH: loop header
LB: loop body
LE: loop exit
PB: predicated region body
PF: predicated region fallthrough
CT: control target
= control target key end

     0   :  { %vm19_vm0 = vcmask 261120   ;;  %v144_v0 = vmov 0.0   ;;  %vm145_vm1 = vmmov 0   ;;  %vm114_vm2 = vcmask 257024   ;;  %s192_s1 = inlined_call_operand.vmem [shape: bf16[32,32], index: 1, kind: input, shape index: {}]   ;;  %s193_s0 = inlined_call_operand.vmem [shape: f32[16,32], index: 0, kind: input, shape index: {}]   ;;  %s194_s2 = inlined_call_operand.vmem [shape: f32[1,32], index: 2, kind: input, shape index: {}]   ;;  %s195_s3 = inlined_call_operand.vmem [shape: bf16[16,32], index: 3, kind: output, shape index: {}]  }
   0x1   :  { %132 = vmatprep.subr.bf16.mxu0 %v144_v0  ;;  %v142_v1 = vld [vmem:[%s192_s1 + $0x8] sm:$0xff]   ;;  %136 = vmatprep.mubr.msk.bf16.mxu0 %vm145_vm1, %v144_v0  ;;  %20 = vst.msk [vmem:[#allocation2] sm:$0xff] %vm19_vm0, %v144_v0  ;;  %21 = vst.msk [vmem:[#allocation2 + $0x8] sm:$0xff] %vm19_vm0, %v144_v0  ;;  %v143_v2 = vld [vmem:[%s192_s1] sm:$0xff]  }
   0x2   :  { %133 = vmatpush3.bf16.msra.mxu0 %v142_v1  ;;  %v24_v3 = vld [vmem:[%s193_s0] sm:$0xff]  ;;  %v25_v4 = vld [vmem:[%s193_s0 + $0x8] sm:$0xff] }
   0x3   :  { %134 = vmatprep.subr.bf16.mxu0 %v144_v0  ;;  %v26_v5 = vpack.c.bf16 %v25_v4, %v24_v3  ;;  %v124_v14 = vld [vmem:[%s194_s2] ss:$0 sm:$0xff] }
   0x6   :  { %135 = vmatpush3.bf16.msra.mxu0 %v143_v2 }
   0x8   :  { %v22_v6 = vld [vmem:[#allocation2] sm:$0xff]  ;;  %v23_v10 = vld [vmem:[#allocation2 + $0x8] sm:$0xff] }
   0x9   :  { %137 = vmatmul.mubr.msk.bf16.vlgmr.msra.gmra.mxu0 %vm19_vm0, %v26_v5 }
  0xc9   :  { %v81_v7 = vpop.f32.mrf.mxu0 }
  0xca   :  { %v88_v8 = vadd.f32 %v81_v7, %v22_v6 }
  0xcb   :  { %v138_v9 = vpop.f32.mrf.mxu0 }
  0xcc   :  { %90 = vst.msk [vmem:[#allocation2] sm:$0xff] %vm19_vm0, %v88_v8 }
  0xcd   :  { %v84_v11 = vpop.f32.mrf.mxu0 }
  0xce   :  { %v89_v12 = vadd.f32 %v84_v11, %v23_v10 }
  0xcf   :  { %v139_v13 = vpop.f32.mrf.mxu0 }
  0xd0   :  { %91 = vst.msk [vmem:[#allocation2 + $0x8] sm:$0xff] %vm19_vm0, %v89_v12 }
  0xd3   :  { %v95_v15 = vld [vmem:[#allocation2] sm:$0xff] }
  0xd4   :  { %v104_v16 = vadd.f32 %v124_v14, %v95_v15 }
  0xd6   :  { %v127_v17 = vpack.c.bf16 %v104_v16, %v104_v16 }
  0xd7   :  { %v96_v18 = vld [vmem:[#allocation2 + $0x8] sm:$0xff] }
  0xd8   :  { %115 = vst.msk [vmem:[%s195_s3] sm:$0xf] %vm114_vm2, %v127_v17  ;;  %v105_v19 = vadd.f32 %v124_v14, %v96_v18 }
  0xda   :  { %v128_v20 = vpack.c.bf16 %v105_v19, %v105_v19 }
  0xdc   :  { %116 = vst.msk [vmem:[%s195_s3 + $0x4] sm:$0xf] %vm114_vm2, %v128_v20 }

// kernel: decoder_forward.11
= control target key start
LH: loop header
LB: loop body
LE: loop exit
PB: predicated region body
PF: predicated region fallthrough
CT: control target
= control target key end

     0   :  { %s1026_s12 = smov 0   ;;  %s1028_s13 = smov 0   ;;  %s1147_s0 = inlined_call_operand.vmem [shape: bf16[2,8,96], index: 0, kind: input, shape index: {}, may-alias: {0,1}]   ;;  %s1148_s1 = inlined_call_operand.vmem [shape: bf16[2,8,96], index: 1, kind: input, shape index: {}, may-alias: {0,1}]   ;;  %s1149_s2 = inlined_call_operand.vmem [shape: s8[2,8,8], index: 2, kind: input, shape index: {}]   ;;  %s1150_s3 = inlined_call_operand.vmem [shape: f32[2,8,32], index: 3, kind: output, shape index: {}]  }
   0x1   :  { %s1030_s14 = smov 0  }
   0x2 LB: > { %s25_s15 = sadd.s32 1, %s983_s13  ;;  %p827_p0 = scmp.ge.s32.totalorder %s987_s14, 1  ;;  %s987_s14 = sphi %s1030_s14, %s13_s14   ;;  %s983_s13 = sphi %s1028_s13, %s1154_s13   ;;  %s979_s12 = sphi %s1026_s12, %s1153_s12  }
   0x3   : > { %p27_p1 = scmp.ge.s32.totalorder %s25_s15, 2  ;;  %p178_p2 = scmp.lt.s32.totalorder %s987_s14, 3 }
   0x5   : > { %s1156_s15 = smov (%p27_p1, %s25_s15), 0  ;;  %p179_p3 = pnand %p827_p0, %p178_p2 }
   0x6   : > { %p217_p4 = scmp.lt.s32.totalorder (!%p179_p3), %s979_s12, 1  ;;  %s991_s20 = smov (!%p179_p3), 96  }
   0x7   : > { %182 = sbr.rel (%p179_p3) target bundleno = 1533 (0x5fd), region = 32  ;;  %s992_s24 = smov (!%p179_p3), 64  }
   0x8   : > { %s993_s25 = smov (!%p179_p3), 88   ;;  %s995_s30 = smov (!%p179_p3), 72  }
   0x9   : > { %s996_s4 = smov (!%p179_p3), 120   ;;  %s997_s5 = smov (!%p179_p3), 80  }
   0xa   : > { %s998_s6 = smov (!%p179_p3), 112   ;;  %s999_s7 = smov (!%p179_p3), 104  }
   0xb   : > { %s1002_s17 = smov (!%p179_p3), 40   ;;  %s1003_s18 = smov (!%p179_p3), 8  }
   0xc   : > { %v989_v0 = vmov 0.0   ;;  %vm990_vm0 = vmmov 0   ;;  %s1158_s12 = smov (!%p217_p4, %s979_s12), 1  ;;  %vm257_vm1 = vcmask 64512   ;;  %v994_v9 = vmov 0  }
   0xd   : > { %859 = vmatprep.subr.bf16.mxu0 %v989_v0  ;;  %861 = vmatprep.mubr.msk.bf16.mxu0 %vm990_vm0, %v989_v0  ;;  %s828_s16 = sshll.u32 %s1158_s12, 2  ;;  %s830_s26 = sshll.u32 %s1158_s12, 1  ;;  %vm325_vm4 = vcmask 1043456   ;;  %vm486_vm5 = vcmask 130112   ;;  %vm603_vm6 = vcmask 195712   ;;  %vm720_vm7 = vcmask 261312  }
   0xe   : > { %865 = vmatprep.subr.bf16.mxu1 %v989_v0  ;;  %867 = vmatprep.mubr.msk.bf16.mxu1 %vm990_vm0, %v989_v0  ;;  %s227_s19 = scalar_lea.vmem %s1148_s1, %s828_s16  ;;  %s223_s23 = scalar_lea.vmem %s1147_s0, %s828_s16 }
   0xf   : > { %v1056_v1 = vld [vmem:[%s227_s19] ss:$0 sps:$4 sm:$0xff]   ;;  %s234_s29 = scalar_lea.vmem %s1149_s2, %s830_s26  ;;  %s831_s8 = sshll.u32 %s1158_s12, 3 }
  0x10   : > { %255 = vrot.lane.b32.xlu0 %v1056_v1, %s991_s20  ;;  %v245_v2 = vld [vmem:[%s223_s23] sm:$0xf]  ;;  %320 = vrot.lane.b32.xlu1 %v1056_v1, %s992_s24  ;;  %s1104_s11 = scalar_lea.vmem %s1150_s3, %s831_s8  ;;  %s1000_s12 = smov 56  }
  0x11   : > { %v246_v3 = vunpack.c.l.bf16 %v245_v2  ;;  %v249_v8 = vld [vmem:[%s234_s29] sm:$0x3]  ;;  %s1001_s16 = smov 48   ;;  %s1004_s19 = smov 16  }
  0x12   : > { %vm250_vm2 = vnez %v249_v8  ;;  %s1005_s20 = smov 24  }
  0x13   : > { %v247_v6 = vmul.f32 0.35355338, %v246_v3  ;;  %v304_v10 = vsel %vm250_vm2, 16843009, %v994_v9 }
  0x14   : > { %373 = vrot.lane.b32.xlu1 %v1056_v1, %s993_s25  ;;  %v305_v11 = vunpack.c.0.s8 %v304_v10 }
  0x15   : > { %v251_v7 = vpack.c.bf16 %v247_v6, %v247_v6 }
  0x16   : > { %vm1073_vm3 = vcmp.ne.s32.totalorder %v305_v11, 0 }
  0x82   : > { %v256_v4 = vpop.permute.xlu0 %255  ;;  %v321_v19 = vpop.permute.xlu1 %320 }
  0x83   : > { %v262_v5 = vsel %vm257_vm1, %v256_v4, 0  ;;  %v327_v20 = vsel %vm325_vm4, %v321_v19, 0 }
  0x84   : > { %860 = vmatpush3.bf16.xpose.msra.mxu0 %v262_v5  ;;  %866 = vmatpush3.bf16.msra.mxu1 %v327_v20 }
  0x85   : > { %877 = vmatprep.subr.bf16.mxu0 %v989_v0  ;;  %871 = vmatprep.subr.bf16.mxu1 %v989_v0 }
  0x86   : > { %v374_v26 = vpop.permute.xlu1 %373 }
  0x87   : > { %v379_v32 = vsel %vm257_vm1, %v374_v26, 0 }
  0x8b   : > { %862 = vmatmul.mubr.msk.bf16.vlgmr.msra.gmra.mxu0 %vm257_vm1, %v251_v7 }
  0x8c   : > { %879 = vmatprep.mubr.msk.bf16.mxu0 %vm990_vm0, %v989_v0 }
 0x14b   : > { %v298_v13 = vpop.f32.mrf.mxu0 }
 0x14c   : > { %v307_v14 = vsel %vm1073_vm3, -1e+09, %v298_v13 }
 0x14d   : > { %v863_v15 = vpop.f32.mrf.mxu0  ;;  %v308_v16 = vsel %vm257_vm1, %v307_v14, -inf }
 0x14e   : > { %309 = vmax.xlane.f32.xlu0 %v308_v16 }
 0x14f   : > { %v301_v17 = vpop.f32.mrf.mxu0 }
 0x151   : > { %v864_v18 = vpop.f32.mrf.mxu0 }
 0x164   : > { %607 = vrot.lane.b32.xlu0 %v1056_v1, %s995_s30 }
 0x1d7   : > { %v310_v21 = vpop.xlane.xlu0 %309 }
 0x1d8   : > { %v311_v22 = vsub.f32 %v307_v14, %v310_v21 }
 0x1da   : > { %v312_v23 = vmul.f32 1.442695, %v311_v22 }
 0x1db   : > { %v608_v35 = vpop.permute.xlu0 %607 }
 0x1dc   : > { %949 = vpow2.f32 %v312_v23  ;;  %v613_v37 = vsel %vm257_vm1, %v608_v35, 0 }
 0x1e9   : > { %v950_v24 = vpop.eup %949 }
 0x1ea   : > { %v314_v25 = vsel %vm257_vm1, %v950_v24, 0.0 }
 0x1eb   : > { %315 = vadd.xlane.f32.xlu1 %v314_v25 }
 0x1fc   : > { %371 = vrot.lane.b32.xlu1 %v251_v7, %s996_s4 }
 0x200   : > { %490 = vrot.lane.b32.xlu1 %v1056_v1, %s997_s5 }
 0x204   : > { %488 = vrot.lane.b32.xlu1 %v251_v7, %s998_s6 }
 0x208   : > { %605 = vrot.lane.b32.xlu1 %v251_v7, %s999_s7 }
 0x274   : > { %v316_v27 = vpop.xlane.xlu1 %315 }
 0x275   : > { %951 = vrcp.f32 %v316_v27 }
 0x278   : > { %v372_v30 = vpop.permute.xlu1 %371 }
 0x27c   : > { %v491_v33 = vpop.permute.xlu1 %490 }
 0x27d   : > { %v496_v34 = vsel %vm257_vm1, %v491_v33, 0 }
 0x280   : > { %v489_v36 = vpop.permute.xlu1 %488 }
 0x282   : > { %v952_v28 = vpop.eup %951 }
 0x283   : > { %v318_v29 = vmul.f32 %v952_v28, %v950_v24 }
 0x284   : > { %v606_v38 = vpop.permute.xlu1 %605 }
 0x285   : > { %v319_v31 = vpack.c.bf16 %v318_v29, %v318_v29 }
 0x287   : > { %868 = vmatmul.mubr.msk.bf16.vlgmr.msra.gmra.mxu1 %vm257_vm1, %v319_v31 }
 0x288   : > { %872 = vmatpush3.bf16.xpose.msra.mxu1 %v379_v32  ;;  %873 = vmatprep.mubr.msk.bf16.mxu1 %vm990_vm0, %v989_v0 }
 0x289   : > { %883 = vmatprep.subr.bf16.mxu1 %v989_v0 }
 0x28f   : > { %874 = vmatmul.mubr.msk.bf16.vlgmr.msra.gmra.mxu1 %vm257_vm1, %v372_v30 }
 0x290   : > { %884 = vmatpush3.bf16.xpose.msra.mxu1 %v496_v34  ;;  %885 = vmatprep.mubr.msk.bf16.mxu1 %vm990_vm0, %v989_v0 }
 0x291   : > { %895 = vmatprep.subr.bf16.mxu1 %v989_v0 }
 0x297   : > { %886 = vmatmul.mubr.msk.bf16.vlgmr.msra.gmra.mxu1 %vm257_vm1, %v489_v36 }
 0x298   : > { %896 = vmatpush3.bf16.xpose.msra.mxu1 %v613_v37  ;;  %897 = vmatprep.mubr.msk.bf16.mxu1 %vm990_vm0, %v989_v0 }
 0x29f   : > { %898 = vmatmul.mubr.msk.bf16.vlgmr.msra.gmra.mxu1 %vm257_vm1, %v606_v38 }
 0x347   : > { %v363_v39 = vpop.f32.mrf.mxu1 }
 0x348   : > { %369 = vst.msk [vmem:[%s1104_s11] sm:$0xff] %vm257_vm1, %v363_v39 }
 0x349   : > { %v869_v40 = vpop.f32.mrf.mxu1 }
 0x34b   : > { %v366_v41 = vpop.f32.mrf.mxu1 }
 0x34d   : > { %v870_v42 = vpop.f32.mrf.mxu1 }
 0x34f   : > { %v415_v43 = vpop.f32.mrf.mxu1 }
 0x350   : > { %v421_v44 = vsel %vm1073_vm3, -1e+09, %v415_v43 }
 0x351   : > { %v875_v45 = vpop.f32.mrf.mxu1  ;;  %v422_v46 = vsel %vm257_vm1, %v421_v44, -inf }
 0x352   : > { %423 = vmax.xlane.f32.xlu1 %v422_v46 }
 0x353   : > { %v418_v47 = vpop.f32.mrf.mxu1 }
 0x355   : > { %v876_v48 = vpop.f32.mrf.mxu1 }
 0x357   : > { %v532_v49 = vpop.f32.mrf.mxu1 }
 0x358   : > { %v538_v50 = vsel %vm1073_vm3, -1e+09, %v532_v49 }
 0x359   : > { %v887_v51 = vpop.f32.mrf.mxu1  ;;  %v539_v52 = vsel %vm257_vm1, %v538_v50, -inf }
 0x35a   : > { %540 = vmax.xlane.f32.xlu0 %v539_v52 }
 0x35b   : > { %v535_v53 = vpop.f32.mrf.mxu1 }
 0x35d   : > { %v888_v54 = vpop.f32.mrf.mxu1 }
 0x35f   : > { %v649_v55 = vpop.f32.mrf.mxu1 }
 0x360   : > { %v655_v56 = vsel %vm1073_vm3, -1e+09, %v649_v55 }
 0x361   : > { %v656_v57 = vsel %vm257_vm1, %v655_v56, -inf  ;;  %v899_v58 = vpop.f32.mrf.mxu1 }
 0x362   : > { %657 = vmax.xlane.f32.xlu1 %v656_v57 }
 0x363   : > { %v652_v59 = vpop.f32.mrf.mxu1 }
 0x365   : > { %v900_v60 = vpop.f32.mrf.mxu1 }
 0x3db   : > { %v424_v61 = vpop.xlane.xlu1 %423 }
 0x3dc   : > { %v425_v62 = vsub.f32 %v421_v44, %v424_v61 }
 0x3de   : > { %v426_v63 = vmul.f32 1.442695, %v425_v62 }
 0x3e0   : > { %953 = vpow2.f32 %v426_v63 }
 0x3e3   : > { %v541_v9 = vpop.xlane.xlu0 %540 }
 0x3e4   : > { %v542_v10 = vsub.f32 %v538_v50, %v541_v9 }
 0x3e6   : > { %v543_v11 = vmul.f32 1.442695, %v542_v10 }
 0x3eb   : > { %v658_v2 = vpop.xlane.xlu1 %657 }
 0x3ec   : > { %v659_v3 = vsub.f32 %v655_v56, %v658_v2 }
 0x3ed   : > { %v954_v4 = vpop.eup %953 }
 0x3ee   : > { %v660_v5 = vmul.f32 1.442695, %v659_v3  ;;  %v428_v6 = vsel %vm257_vm1, %v954_v4, 0.0 }
 0x3ef   : > { %429 = vadd.xlane.f32.xlu1 %v428_v6 }
 0x3f0   : > { %955 = vpow2.f32 %v660_v5 }
 0x3f1   : > { %957 = vpow2.f32 %v543_v11 }
 0x3fd   : > { %v956_v7 = vpop.eup %955 }
 0x3fe   : > { %v662_v8 = vsel %vm257_vm1, %v956_v7, 0.0  ;;  %v958_v12 = vpop.eup %957 }
 0x3ff   : > { %663 = vadd.xlane.f32.xlu0 %v662_v8  ;;  %v545_v13 = vsel %vm257_vm1, %v958_v12, 0.0 }
 0x400   : > { %434 = vrot.lane.b32.xlu1 %v1056_v1, %s1000_s12 }
 0x415   : > { %551 = vrot.lane.b32.xlu0 %v1056_v1, %s1001_s16 }
 0x424   : > { %546 = vadd.xlane.f32.xlu1 %v545_v13 }
 0x435   : > { %668 = vrot.lane.b32.xlu1 %v1056_v1, %s1002_s17 }
 0x478   : > { %v430_v14 = vpop.xlane.xlu1 %429 }
 0x479   : > { %959 = vrcp.f32 %v430_v14 }
 0x47c   : > { %v435_v15 = vpop.permute.xlu1 %434 }
 0x47d   : > { %v440_v16 = vsel %vm325_vm4, %v435_v15, 0 }
 0x47e   : > { %878 = vmatpush3.bf16.msra.mxu0 %v440_v16 }
 0x47f   : > { %889 = vmatprep.subr.bf16.mxu0 %v989_v0 }
 0x486   : > { %v960_v17 = vpop.eup %959 }
 0x487   : > { %v432_v18 = vmul.f32 %v960_v17, %v954_v4 }
 0x488   : > { %v664_v19 = vpop.xlane.xlu0 %663 }
 0x489   : > { %v433_v20 = vpack.c.bf16 %v432_v18, %v432_v18 }
 0x48b   : > { %880 = vmatmul.mubr.msk.bf16.vlgmr.msra.gmra.mxu0 %vm257_vm1, %v433_v20 }
 0x48c   : > { %v552_v21 = vpop.permute.xlu0 %551  ;;  %891 = vmatprep.mubr.msk.bf16.mxu0 %vm990_vm0, %v989_v0 }
 0x48d   : > { %v557_v1 = vsel %vm325_vm4, %v552_v21, 0 }
 0x48e   : > { %890 = vmatpush3.bf16.msra.mxu0 %v557_v1 }
 0x48f   : > { %901 = vmatprep.subr.bf16.mxu0 %v989_v0 }
 0x4ad   : > { %v547_v22 = vpop.xlane.xlu1 %546 }
 0x4ae   : > { %961 = vrcp.f32 %v547_v22 }
 0x4af   : > { %963 = vrcp.f32 %v664_v19 }
 0x4b1   : > { %v669_v24 = vpop.permute.xlu1 %668 }
 0x4b2   : > { %v674_v26 = vsel %vm325_vm4, %v669_v24, 0 }
 0x4bb   : > { %v962_v23 = vpop.eup %961 }
 0x4bc   : > { %v549_v25 = vmul.f32 %v962_v23, %v958_v12  ;;  %v964_v28 = vpop.eup %963 }
 0x4bd   : > { %v666_v29 = vmul.f32 %v964_v28, %v956_v7 }
 0x4be   : > { %v550_v27 = vpack.c.bf16 %v549_v25, %v549_v25 }
 0x4bf   : > { %v667_v30 = vpack.c.bf16 %v666_v29, %v666_v29 }
 0x4c0   : > { %892 = vmatmul.mubr.msk.bf16.vlgmr.msra.gmra.mxu0 %vm257_vm1, %v550_v27 }
 0x4c1   : > { %902 = vmatpush3.bf16.msra.mxu0 %v674_v26  ;;  %903 = vmatprep.mubr.msk.bf16.mxu0 %vm990_vm0, %v989_v0 }
 0x4c8   : > { %904 = vmatmul.mubr.msk.bf16.vlgmr.msra.gmra.mxu0 %vm257_vm1, %v667_v30 }
 0x54b   : > { %v476_v31 = vpop.f32.mrf.mxu0 }
 0x54c   : > { %483 = vrot.lane.b32.xlu1 %v476_v31, %s1003_s18 }
 0x54d   : > { %v881_v32 = vpop.f32.mrf.mxu0 }
 0x54f   : > { %v479_v33 = vpop.f32.mrf.mxu0 }
 0x551   : > { %v882_v34 = vpop.f32.mrf.mxu0 }
 0x580   : > { %v593_v35 = vpop.f32.mrf.mxu0 }
 0x581   : > { %600 = vrot.lane.b32.xlu0 %v593_v35, %s1004_s19 }
 0x582   : > { %v893_v36 = vpop.f32.mrf.mxu0 }
 0x584   : > { %v596_v37 = vpop.f32.mrf.mxu0 }
 0x586   : > { %v894_v38 = vpop.f32.mrf.mxu0 }
 0x588   : > { %v710_v0 = vpop.f32.mrf.mxu0 }
 0x589   : > { %717 = vrot.lane.b32.xlu1 %v710_v0, %s1005_s20 }
 0x58a   : > { %v905_v39 = vpop.f32.mrf.mxu0 }
 0x58c   : > { %v713_v40 = vpop.f32.mrf.mxu0 }
 0x58e   : > { %v906_v41 = vpop.f32.mrf.mxu0 }
 0x5be   : > { %v484_v42 = vpop.permute.xlu1 %483 }
 0x5bf   : > { %487 = vst.msk [vmem:[%s1104_s11] sm:$0xff] %vm486_vm5, %v484_v42 }
 0x5f3   : > { %v601_v43 = vpop.permute.xlu0 %600 }
 0x5f4   : > { %604 = vst.msk [vmem:[%s1104_s11] sm:$0xff] %vm603_vm6, %v601_v43 }
 0x5fb   : > { %v718_v44 = vpop.permute.xlu1 %717 }
 0x5fc   : > { %721 = vst.msk [vmem:[%s1104_s11] sm:$0xff] %vm720_vm7, %v718_v44 }
 0x5fd PF: > { %s13_s14 = sadd.s32 1, %s987_s14   ;;  %s1153_s12 = smov %s983_s13 }
 0x5fe   : > { %p10_p5 = scmp.ge.s32.totalorder %s13_s14, 4   ;;  %s1154_s13 = smov %s1156_s15 }
 0x600   :  { %12 = sbr.rel (!%p10_p5) target bundleno = 2 (0x2), region = 68 }

// kernel: decoder_forward.14
= control target key start
LH: loop header
LB: loop body
LE: loop exit
PB: predicated region body
PF: predicated region fallthrough
CT: control target
= control target key end

     0   :  { %vm19_vm0 = vcmask 523264   ;;  %v145_v0 = vmov 0.0   ;;  %vm146_vm1 = vmmov 0   ;;  %vm43_vm2 = vcmask 261120   ;;  %s192_s1 = inlined_call_operand.vmem [shape: bf16[32,64], index: 1, kind: input, shape index: {}]   ;;  %s193_s0 = inlined_call_operand.vmem [shape: f32[16,32], index: 0, kind: input, shape index: {}]   ;;  %s194_s2 = inlined_call_operand.vmem [shape: f32[1,64], index: 2, kind: input, shape index: {}]   ;;  %s195_s3 = inlined_call_operand.vmem [shape: bf16[16,64], index: 3, kind: output, shape index: {}]  }
   0x1   :  { %133 = vmatprep.subr.bf16.mxu0 %v145_v0  ;;  %v143_v1 = vld [vmem:[%s192_s1 + $0x8] sm:$0xff]   ;;  %137 = vmatprep.mubr.msk.bf16.mxu0 %vm146_vm1, %v145_v0  ;;  %20 = vst.msk [vmem:[#allocation2] sm:$0xff] %vm19_vm0, %v145_v0  ;;  %21 = vst.msk [vmem:[#allocation2 + $0x8] sm:$0xff] %vm19_vm0, %v145_v0  ;;  %v144_v2 = vld [vmem:[%s192_s1] sm:$0xff]   ;;  %vm115_vm3 = vcmask 519168  }
   0x2   :  { %134 = vmatpush3.bf16.msra.mxu0 %v143_v1  ;;  %v24_v3 = vld [vmem:[%s193_s0] sm:$0xff]  ;;  %v25_v4 = vld [vmem:[%s193_s0 + $0x8] sm:$0xff] }
   0x3   :  { %135 = vmatprep.subr.bf16.mxu0 %v145_v0  ;;  %v26_v5 = vpack.c.bf16 %v25_v4, %v24_v3  ;;  %v125_v14 = vld [vmem:[%s194_s2] ss:$0 sm:$0xff] }
   0x6   :  { %136 = vmatpush3.bf16.msra.mxu0 %v144_v2 }
   0x8   :  { %v22_v6 = vld [vmem:[#allocation2] sm:$0xff]  ;;  %v23_v10 = vld [vmem:[#allocation2 + $0x8] sm:$0xff] }
   0x9   :  { %138 = vmatmul.mubr.msk.bf16.vlgmr.msra.gmra.mxu0 %vm43_vm2, %v26_v5 }
  0xc9   :  { %v81_v7 = vpop.f32.mrf.mxu0 }
  0xca   :  { %v88_v8 = vadd.f32 %v81_v7, %v22_v6 }
  0xcb   :  { %v139_v9 = vpop.f32.mrf.mxu0 }
  0xcc   :  { %91 = vst.msk [vmem:[#allocation2] sm:$0xff] %vm19_vm0, %v88_v8 }
  0xcd   :  { %v84_v11 = vpop.f32.mrf.mxu0 }
  0xce   :  { %v89_v12 = vadd.f32 %v84_v11, %v23_v10 }
  0xcf   :  { %v140_v13 = vpop.f32.mrf.mxu0 }
  0xd0   :  { %92 = vst.msk [vmem:[#allocation2 + $0x8] sm:$0xff] %vm19_vm0, %v89_v12 }
  0xd3   :  { %v96_v15 = vld [vmem:[#allocation2] sm:$0xff] }
  0xd4   :  { %v105_v16 = vadd.f32 %v125_v14, %v96_v15 }
  0xd6   :  { %v128_v17 = vpack.c.bf16 %v105_v16, %v105_v16 }
  0xd7   :  { %v97_v18 = vld [vmem:[#allocation2 + $0x8] sm:$0xff] }
  0xd8   :  { %116 = vst.msk [vmem:[%s195_s3] sm:$0xf] %vm115_vm3, %v128_v17  ;;  %v106_v19 = vadd.f32 %v125_v14, %v97_v18 }
  0xda   :  { %v129_v20 = vpack.c.bf16 %v106_v19, %v106_v19 }
  0xdc   :  { %117 = vst.msk [vmem:[%s195_s3 + $0x4] sm:$0xf] %vm115_vm3, %v129_v20 }

// kernel: decoder_forward.17
= control target key start
LH: loop header
LB: loop body
LE: loop exit
PB: predicated region body
PF: predicated region fallthrough
CT: control target
= control target key end

     0   :  { %vm19_vm0 = vcmask 523264   ;;  %v147_v0 = vmov 0.0   ;;  %vm148_vm1 = vmmov 0   ;;  %vm43_vm2 = vcmask 261120   ;;  %s194_s1 = inlined_call_operand.vmem [shape: bf16[32,64], index: 1, kind: input, shape index: {}]   ;;  %s195_s0 = inlined_call_operand.vmem [shape: f32[16,32], index: 0, kind: input, shape index: {}]   ;;  %s196_s2 = inlined_call_operand.vmem [shape: f32[1,64], index: 2, kind: input, shape index: {}]   ;;  %s197_s3 = inlined_call_operand.vmem [shape: bf16[16,64], index: 3, kind: output, shape index: {}]  }
   0x1   :  { %135 = vmatprep.subr.bf16.mxu0 %v147_v0  ;;  %v145_v1 = vld [vmem:[%s194_s1 + $0x8] sm:$0xff]   ;;  %139 = vmatprep.mubr.msk.bf16.mxu0 %vm148_vm1, %v147_v0  ;;  %20 = vst.msk [vmem:[#allocation2] sm:$0xff] %vm19_vm0, %v147_v0  ;;  %21 = vst.msk [vmem:[#allocation2 + $0x8] sm:$0xff] %vm19_vm0, %v147_v0  ;;  %v146_v2 = vld [vmem:[%s194_s1] sm:$0xff]   ;;  %vm117_vm3 = vcmask 519168  }
   0x2   :  { %136 = vmatpush3.bf16.msra.mxu0 %v145_v1  ;;  %v24_v3 = vld [vmem:[%s195_s0] sm:$0xff]  ;;  %v25_v4 = vld [vmem:[%s195_s0 + $0x8] sm:$0xff] }
   0x3   :  { %137 = vmatprep.subr.bf16.mxu0 %v147_v0  ;;  %v26_v5 = vpack.c.bf16 %v25_v4, %v24_v3  ;;  %v127_v14 = vld [vmem:[%s196_s2] ss:$0 sm:$0xff] }
   0x6   :  { %138 = vmatpush3.bf16.msra.mxu0 %v146_v2 }
   0x8   :  { %v22_v6 = vld [vmem:[#allocation2] sm:$0xff]  ;;  %v23_v10 = vld [vmem:[#allocation2 + $0x8] sm:$0xff] }
   0x9   :  { %140 = vmatmul.mubr.msk.bf16.vlgmr.msra.gmra.mxu0 %vm43_vm2, %v26_v5 }
  0xc9   :  { %v81_v7 = vpop.f32.mrf.mxu0 }
  0xca   :  { %v88_v8 = vadd.f32 %v81_v7, %v22_v6 }
  0xcb   :  { %v141_v9 = vpop.f32.mrf.mxu0 }
  0xcc   :  { %91 = vst.msk [vmem:[#allocation2] sm:$0xff] %vm19_vm0, %v88_v8 }
  0xcd   :  { %v84_v11 = vpop.f32.mrf.mxu0 }
  0xce   :  { %v89_v12 = vadd.f32 %v84_v11, %v23_v10 }
  0xcf   :  { %v142_v13 = vpop.f32.mrf.mxu0 }
  0xd0   :  { %92 = vst.msk [vmem:[#allocation2 + $0x8] sm:$0xff] %vm19_vm0, %v89_v12 }
  0xd3   :  { %v96_v15 = vld [vmem:[#allocation2] sm:$0xff] }
  0xd4   :  { %v105_v16 = vadd.f32 %v127_v14, %v96_v15 }
  0xd6   :  { %v107_v17 = vmax.f32 %v105_v16, 0.0 }
  0xd7   :  { %v97_v18 = vld [vmem:[#allocation2 + $0x8] sm:$0xff] }
  0xd8   :  { %v130_v19 = vpack.c.bf16 %v107_v17, %v107_v17  ;;  %v106_v20 = vadd.f32 %v127_v14, %v97_v18 }
  0xda   :  { %118 = vst.msk [vmem:[%s197_s3] sm:$0xf] %vm117_vm3, %v130_v19  ;;  %v108_v21 = vmax.f32 %v106_v20, 0.0 }
  0xdc   :  { %v131_v22 = vpack.c.bf16 %v108_v21, %v108_v21 }
  0xde   :  { %119 = vst.msk [vmem:[%s197_s3 + $0x4] sm:$0xf] %vm117_vm3, %v131_v22 }

// kernel: decoder_forward.15
= control target key start
LH: loop header
LB: loop body
LE: loop exit
PB: predicated region body
PF: predicated region fallthrough
CT: control target
= control target key end

     0   :  { %s1016_s12 = smov 0   ;;  %s1018_s13 = smov 0   ;;  %s1136_s0 = inlined_call_operand.vmem [shape: bf16[2,8,32], index: 0, kind: input, shape index: {}]   ;;  %s1137_s1 = inlined_call_operand.vmem [shape: bf16[2,8,64], index: 1, kind: input, shape index: {}]   ;;  %s1138_s2 = inlined_call_operand.vmem [shape: s8[2,8,8], index: 2, kind: input, shape index: {}]   ;;  %s1139_s3 = inlined_call_operand.vmem [shape: f32[2,8,32], index: 3, kind: output, shape index: {}]  }
   0x1   :  { %s1020_s14 = smov 0  }
   0x2 LB: > { %s25_s15 = sadd.s32 1, %s977_s13  ;;  %p825_p0 = scmp.ge.s32.totalorder %s981_s14, 1  ;;  %s981_s14 = sphi %s1020_s14, %s13_s14   ;;  %s977_s13 = sphi %s1018_s13, %s1143_s13   ;;  %s973_s12 = sphi %s1016_s12, %s1142_s12  }
   0x3   : > { %p27_p1 = scmp.ge.s32.totalorder %s25_s15, 2  ;;  %p178_p2 = scmp.lt.s32.totalorder %s981_s14, 3 }
   0x5   : > { %s1145_s15 = smov (%p27_p1, %s25_s15), 0  ;;  %p179_p3 = pnand %p825_p0, %p178_p2 }
   0x6   : > { %p217_p4 = scmp.lt.s32.totalorder (!%p179_p3), %s973_s12, 1  ;;  %s986_s27 = smov (!%p179_p3), 96  }
   0x7   : > { %182 = sbr.rel (%p179_p3) target bundleno = 1374 (0x55e), region = 32  ;;  %s987_s28 = smov (!%p179_p3), 120  }
   0x8   : > { %s988_s29 = smov (!%p179_p3), 112   ;;  %s989_s30 = smov (!%p179_p3), 104  }
   0x9   : > { %s990_s8 = smov (!%p179_p3), 88   ;;  %s991_s9 = smov (!%p179_p3), 72  }
   0xa   : > { %s992_s10 = smov (!%p179_p3), 80   ;;  %s993_s11 = smov (!%p179_p3), 8  }
   0xc   : > { %v983_v0 = vmov 0.0   ;;  %vm984_vm0 = vmmov 0   ;;  %s1147_s12 = smov (!%p217_p4, %s973_s12), 1  ;;  %vm252_vm1 = vcmask 64512   ;;  %v985_v8 = vmov 0  }
   0xd   : > { %857 = vmatprep.subr.bf16.mxu0 %v983_v0  ;;  %859 = vmatprep.mubr.msk.bf16.mxu0 %vm984_vm0, %v983_v0  ;;  %s826_s16 = sshll.u32 %s1147_s12, 2  ;;  %s828_s23 = sshll.u32 %s1147_s12, 1  ;;  %vm323_vm4 = vcmask 1043456   ;;  %vm484_vm5 = vcmask 130112   ;;  %vm601_vm6 = vcmask 195712   ;;  %vm718_vm7 = vcmask 261312  }
   0xe   : > { %863 = vmatprep.subr.bf16.mxu1 %v983_v0  ;;  %865 = vmatprep.mubr.msk.bf16.mxu1 %vm984_vm0, %v983_v0  ;;  %s223_s19 = scalar_lea.vmem %s1136_s0, %s826_s16  ;;  %s227_s22 = scalar_lea.vmem %s1137_s1, %s826_s16 }
   0xf   : > { %v245_v1 = vld [vmem:[%s223_s19] sm:$0xf]  ;;  %s234_s26 = scalar_lea.vmem %s1138_s2, %s828_s23  ;;  %s829_s4 = sshll.u32 %s1147_s12, 3 }
  0x10   : > { %v248_v2 = vld [vmem:[%s227_s22] sm:$0xf]  ;;  %v246_v3 = vunpack.c.l.bf16 %v245_v1  ;;  %s1093_s7 = scalar_lea.vmem %s1139_s3, %s829_s4  ;;  %s994_s12 = smov 16  }
  0x11   : > { %v257_v4 = vsel %vm252_vm1, %v248_v2, 0  ;;  %v249_v7 = vld [vmem:[%s234_s26] sm:$0x3]  ;;  %v1065_v18 = vcombine.low %v248_v2, %v248_v2  ;;  %s995_s16 = smov 24  }
  0x12   : > { %858 = vmatpush3.bf16.xpose.msra.mxu0 %v257_v4  ;;  %v247_v5 = vmul.f32 0.35355338, %v246_v3  ;;  %vm250_vm2 = vnez %v249_v7 }
  0x13   : > { %875 = vmatprep.subr.bf16.mxu0 %v983_v0  ;;  %v299_v9 = vsel %vm250_vm2, 16843009, %v985_v8  ;;  %318 = vrot.lane.b32.xlu1 %v1065_v18, %s986_s27 }
  0x14   : > { %v251_v6 = vpack.c.bf16 %v247_v5, %v247_v5  ;;  %v300_v10 = vunpack.c.0.s8 %v299_v9 }
  0x16   : > { %vm1058_vm3 = vcmp.ne.s32.totalorder %v300_v10, 0 }
  0x17   : > { %371 = vrot.lane.b32.xlu1 %v1065_v18, %s987_s28 }
  0x19   : > { %860 = vmatmul.mubr.msk.bf16.vlgmr.msra.gmra.mxu0 %vm252_vm1, %v251_v6 }
  0x1a   : > { %877 = vmatprep.mubr.msk.bf16.mxu0 %vm984_vm0, %v983_v0 }
  0x1b   : > { %488 = vrot.lane.b32.xlu1 %v1065_v18, %s988_s29 }
  0x1f   : > { %486 = vrot.lane.b32.xlu1 %v251_v6, %s988_s29 }
  0x23   : > { %605 = vrot.lane.b32.xlu1 %v1065_v18, %s989_s30 }
  0x27   : > { %603 = vrot.lane.b32.xlu1 %v251_v6, %s989_s30 }
  0x85   : > { %v319_v24 = vpop.permute.xlu1 %318 }
  0x86   : > { %v325_v25 = vsel %vm323_vm4, %v319_v24, 0 }
  0x87   : > { %864 = vmatpush3.bf16.msra.mxu1 %v325_v25 }
  0x88   : > { %869 = vmatprep.subr.bf16.mxu1 %v983_v0 }
  0x89   : > { %v372_v28 = vpop.permute.xlu1 %371 }
  0x8a   : > { %v377_v30 = vsel %vm252_vm1, %v372_v28, 0 }
  0x8d   : > { %v489_v32 = vpop.permute.xlu1 %488 }
  0x8e   : > { %v494_v35 = vsel %vm252_vm1, %v489_v32, 0 }
  0x91   : > { %v487_v34 = vpop.permute.xlu1 %486 }
  0x95   : > { %v606_v36 = vpop.permute.xlu1 %605 }
  0x96   : > { %v611_v37 = vsel %vm252_vm1, %v606_v36, 0 }
  0x99   : > { %v604_v38 = vpop.permute.xlu1 %603 }
  0xd9   : > { %v293_v12 = vpop.f32.mrf.mxu0 }
  0xda   : > { %v302_v13 = vsel %vm1058_vm3, -1e+09, %v293_v12 }
  0xdb   : > { %v861_v14 = vpop.f32.mrf.mxu0  ;;  %v303_v15 = vsel %vm252_vm1, %v302_v13, -inf }
  0xdc   : > { %304 = vmax.xlane.f32.xlu0 %v303_v15 }
  0xdd   : > { %v296_v16 = vpop.f32.mrf.mxu0 }
  0xdf   : > { %v862_v17 = vpop.f32.mrf.mxu0 }
 0x165   : > { %v305_v19 = vpop.xlane.xlu0 %304 }
 0x166   : > { %v306_v20 = vsub.f32 %v302_v13, %v305_v19 }
 0x168   : > { %v307_v21 = vmul.f32 1.442695, %v306_v20 }
 0x16a   : > { %943 = vpow2.f32 %v307_v21 }
 0x177   : > { %v944_v22 = vpop.eup %943 }
 0x178   : > { %v309_v23 = vsel %vm252_vm1, %v944_v22, 0.0 }
 0x179   : > { %310 = vadd.xlane.f32.xlu0 %v309_v23 }
 0x18f   : > { %369 = vrot.lane.b32.xlu0 %v251_v6, %s987_s28 }
 0x202   : > { %v311_v26 = vpop.xlane.xlu0 %310 }
 0x203   : > { %945 = vrcp.f32 %v311_v26 }
 0x206   : > { %v370_v33 = vpop.permute.xlu0 %369 }
 0x210   : > { %v946_v27 = vpop.eup %945 }
 0x211   : > { %v313_v29 = vmul.f32 %v946_v27, %v944_v22 }
 0x213   : > { %v314_v31 = vpack.c.bf16 %v313_v29, %v313_v29 }
 0x215   : > { %866 = vmatmul.mubr.msk.bf16.vlgmr.msra.gmra.mxu1 %vm252_vm1, %v314_v31 }
 0x216   : > { %870 = vmatpush3.bf16.xpose.msra.mxu1 %v377_v30  ;;  %871 = vmatprep.mubr.msk.bf16.mxu1 %vm984_vm0, %v983_v0 }
 0x217   : > { %881 = vmatprep.subr.bf16.mxu1 %v983_v0 }
 0x21d   : > { %872 = vmatmul.mubr.msk.bf16.vlgmr.msra.gmra.mxu1 %vm252_vm1, %v370_v33 }
 0x21e   : > { %882 = vmatpush3.bf16.xpose.msra.mxu1 %v494_v35  ;;  %883 = vmatprep.mubr.msk.bf16.mxu1 %vm984_vm0, %v983_v0 }
 0x21f   : > { %893 = vmatprep.subr.bf16.mxu1 %v983_v0 }
 0x225   : > { %884 = vmatmul.mubr.msk.bf16.vlgmr.msra.gmra.mxu1 %vm252_vm1, %v487_v34 }
 0x226   : > { %894 = vmatpush3.bf16.xpose.msra.mxu1 %v611_v37  ;;  %895 = vmatprep.mubr.msk.bf16.mxu1 %vm984_vm0, %v983_v0 }
 0x22d   : > { %896 = vmatmul.mubr.msk.bf16.vlgmr.msra.gmra.mxu1 %vm252_vm1, %v604_v38 }
 0x2d5   : > { %v361_v39 = vpop.f32.mrf.mxu1 }
 0x2d6   : > { %367 = vst.msk [vmem:[%s1093_s7] sm:$0xff] %vm252_vm1, %v361_v39 }
 0x2d7   : > { %v867_v40 = vpop.f32.mrf.mxu1 }
 0x2d9   : > { %v364_v41 = vpop.f32.mrf.mxu1 }
 0x2db   : > { %v868_v42 = vpop.f32.mrf.mxu1 }
 0x2dd   : > { %v413_v43 = vpop.f32.mrf.mxu1 }
 0x2de   : > { %v419_v44 = vsel %vm1058_vm3, -1e+09, %v413_v43 }
 0x2df   : > { %v873_v45 = vpop.f32.mrf.mxu1  ;;  %v420_v46 = vsel %vm252_vm1, %v419_v44, -inf }
 0x2e0   : > { %421 = vmax.xlane.f32.xlu1 %v420_v46 }
 0x2e1   : > { %v416_v47 = vpop.f32.mrf.mxu1 }
 0x2e3   : > { %v874_v48 = vpop.f32.mrf.mxu1 }
 0x2e5   : > { %v530_v49 = vpop.f32.mrf.mxu1 }
 0x2e6   : > { %v536_v50 = vsel %vm1058_vm3, -1e+09, %v530_v49 }
 0x2e7   : > { %v885_v51 = vpop.f32.mrf.mxu1  ;;  %v537_v52 = vsel %vm252_vm1, %v536_v50, -inf }
 0x2e8   : > { %538 = vmax.xlane.f32.xlu0 %v537_v52 }
 0x2e9   : > { %v533_v53 = vpop.f32.mrf.mxu1 }
 0x2eb   : > { %v886_v54 = vpop.f32.mrf.mxu1 }
 0x2ed   : > { %v647_v55 = vpop.f32.mrf.mxu1 }
 0x2ee   : > { %v653_v56 = vsel %vm1058_vm3, -1e+09, %v647_v55 }
 0x2ef   : > { %v897_v57 = vpop.f32.mrf.mxu1  ;;  %v654_v58 = vsel %vm252_vm1, %v653_v56, -inf }
 0x2f0   : > { %655 = vmax.xlane.f32.xlu1 %v654_v58 }
 0x2f1   : > { %v650_v59 = vpop.f32.mrf.mxu1 }
 0x2f3   : > { %v898_v60 = vpop.f32.mrf.mxu1 }
 0x301   : > { %432 = vrot.lane.b32.xlu1 %v1065_v18, %s990_s8 }
 0x369   : > { %v422_v61 = vpop.xlane.xlu1 %421 }
 0x36a   : > { %v423_v62 = vsub.f32 %v419_v44, %v422_v61 }
 0x36c   : > { %v424_v63 = vmul.f32 1.442695, %v423_v62 }
 0x36e   : > { %947 = vpow2.f32 %v424_v63 }
 0x371   : > { %v539_v1 = vpop.xlane.xlu0 %538 }
 0x372   : > { %v540_v2 = vsub.f32 %v536_v50, %v539_v1 }
 0x374   : > { %v541_v3 = vmul.f32 1.442695, %v540_v2 }
 0x376   : > { %949 = vpow2.f32 %v541_v3 }
 0x379   : > { %v656_v4 = vpop.xlane.xlu1 %655 }
 0x37a   : > { %v657_v5 = vsub.f32 %v653_v56, %v656_v4 }
 0x37b   : > { %v948_v6 = vpop.eup %947 }
 0x37c   : > { %v658_v7 = vmul.f32 1.442695, %v657_v5  ;;  %v426_v8 = vsel %vm252_vm1, %v948_v6, 0.0 }
 0x37d   : > { %427 = vadd.xlane.f32.xlu0 %v426_v8  ;;  %v433_v9 = vpop.permute.xlu1 %432 }
 0x37e   : > { %951 = vpow2.f32 %v658_v7  ;;  %v438_v10 = vsel %vm323_vm4, %v433_v9, 0 }
 0x37f   : > { %876 = vmatpush3.bf16.msra.mxu0 %v438_v10 }
 0x380   : > { %887 = vmatprep.subr.bf16.mxu0 %v983_v0 }
 0x383   : > { %v950_v11 = vpop.eup %949 }
 0x384   : > { %v543_v12 = vsel %vm252_vm1, %v950_v11, 0.0 }
 0x385   : > { %544 = vadd.xlane.f32.xlu1 %v543_v12 }
 0x38b   : > { %v952_v13 = vpop.eup %951 }
 0x38c   : > { %v660_v14 = vsel %vm252_vm1, %v952_v13, 0.0 }
 0x38d   : > { %661 = vadd.xlane.f32.xlu0 %v660_v14 }
 0x396   : > { %666 = vrot.lane.b32.xlu1 %v1065_v18, %s991_s9 }
 0x3a3   : > { %549 = vrot.lane.b32.xlu0 %v1065_v18, %s992_s10 }
 0x406   : > { %v428_v15 = vpop.xlane.xlu0 %427 }
 0x407   : > { %953 = vrcp.f32 %v428_v15 }
 0x40e   : > { %v545_v16 = vpop.xlane.xlu1 %544 }
 0x40f   : > { %955 = vrcp.f32 %v545_v16 }
 0x412   : > { %v667_v18 = vpop.permute.xlu1 %666 }
 0x413   : > { %v672_v27 = vsel %vm323_vm4, %v667_v18, 0 }
 0x414   : > { %v954_v17 = vpop.eup %953 }
 0x415   : > { %v430_v19 = vmul.f32 %v954_v17, %v948_v6 }
 0x416   : > { %v662_v20 = vpop.xlane.xlu0 %661 }
 0x417   : > { %957 = vrcp.f32 %v662_v20  ;;  %v431_v21 = vpack.c.bf16 %v430_v19, %v430_v19 }
 0x419   : > { %878 = vmatmul.mubr.msk.bf16.vlgmr.msra.gmra.mxu0 %vm252_vm1, %v431_v21 }
 0x41a   : > { %v550_v22 = vpop.permute.xlu0 %549  ;;  %889 = vmatprep.mubr.msk.bf16.mxu0 %vm984_vm0, %v983_v0 }
 0x41b   : > { %v555_v23 = vsel %vm323_vm4, %v550_v22, 0 }
 0x41c   : > { %v956_v24 = vpop.eup %955  ;;  %888 = vmatpush3.bf16.msra.mxu0 %v555_v23 }
 0x41d   : > { %v547_v25 = vmul.f32 %v956_v24, %v950_v11  ;;  %899 = vmatprep.subr.bf16.mxu0 %v983_v0 }
 0x41f   : > { %v548_v26 = vpack.c.bf16 %v547_v25, %v547_v25 }
 0x421   : > { %890 = vmatmul.mubr.msk.bf16.vlgmr.msra.gmra.mxu0 %vm252_vm1, %v548_v26 }
 0x422   : > { %900 = vmatpush3.bf16.msra.mxu0 %v672_v27  ;;  %901 = vmatprep.mubr.msk.bf16.mxu0 %vm984_vm0, %v983_v0 }
 0x424   : > { %v958_v28 = vpop.eup %957 }
 0x425   : > { %v664_v29 = vmul.f32 %v958_v28, %v952_v13 }
 0x427   : > { %v665_v30 = vpack.c.bf16 %v664_v29, %v664_v29 }
 0x429   : > { %902 = vmatmul.mubr.msk.bf16.vlgmr.msra.gmra.mxu0 %vm252_vm1, %v665_v30 }
 0x4d9   : > { %v474_v31 = vpop.f32.mrf.mxu0 }
 0x4da   : > { %481 = vrot.lane.b32.xlu1 %v474_v31, %s993_s11 }
 0x4db   : > { %v879_v32 = vpop.f32.mrf.mxu0 }
 0x4dd   : > { %v477_v33 = vpop.f32.mrf.mxu0 }
 0x4df   : > { %v880_v34 = vpop.f32.mrf.mxu0 }
 0x4e1   : > { %v591_v35 = vpop.f32.mrf.mxu0 }
 0x4e2   : > { %598 = vrot.lane.b32.xlu0 %v591_v35, %s994_s12 }
 0x4e3   : > { %v891_v36 = vpop.f32.mrf.mxu0 }
 0x4e5   : > { %v594_v37 = vpop.f32.mrf.mxu0 }
 0x4e7   : > { %v892_v0 = vpop.f32.mrf.mxu0 }
 0x4e9   : > { %v708_v38 = vpop.f32.mrf.mxu0 }
 0x4ea   : > { %715 = vrot.lane.b32.xlu1 %v708_v38, %s995_s16 }
 0x4eb   : > { %v903_v39 = vpop.f32.mrf.mxu0 }
 0x4ed   : > { %v711_v40 = vpop.f32.mrf.mxu0 }
 0x4ef   : > { %v904_v41 = vpop.f32.mrf.mxu0 }
 0x54c   : > { %v482_v42 = vpop.permute.xlu1 %481 }
 0x54d   : > { %485 = vst.msk [vmem:[%s1093_s7] sm:$0xff] %vm484_vm5, %v482_v42 }
 0x554   : > { %v599_v43 = vpop.permute.xlu0 %598 }
 0x555   : > { %602 = vst.msk [vmem:[%s1093_s7] sm:$0xff] %vm601_vm6, %v599_v43 }
 0x55c   : > { %v716_v44 = vpop.permute.xlu1 %715 }
 0x55d   : > { %719 = vst.msk [vmem:[%s1093_s7] sm:$0xff] %vm718_vm7, %v716_v44 }
 0x55e PF: > { %s13_s14 = sadd.s32 1, %s981_s14   ;;  %s1142_s12 = smov %s977_s13 }
 0x55f   : > { %p10_p5 = scmp.ge.s32.totalorder %s13_s14, 4   ;;  %s1143_s13 = smov %s1145_s15 }
 0x561   :  { %12 = sbr.rel (!%p10_p5) target bundleno = 2 (0x2), region = 68 }

// kernel: decoder_forward.19
= control target key start
LH: loop header
LB: loop body
LE: loop exit
PB: predicated region body
PF: predicated region fallthrough
CT: control target
= control target key end

     0   :  { %v170_v1 = vmov 0.0   ;;  %vm171_vm0 = vmmov 0   ;;  %vm20_vm1 = vcmask 408576   ;;  %s219_s0 = inlined_call_operand.vmem [shape: f32[16,32], index: 0, kind: input, shape index: {}]   ;;  %s220_s1 = inlined_call_operand.vmem [shape: bf16[32,50], index: 1, kind: input, shape index: {}]   ;;  %s221_s2 = inlined_call_operand.vmem [shape: f32[1,50], index: 2, kind: input, shape index: {}]   ;;  %s222_s3 = inlined_call_operand.hbm [shape: f32[16,50], index: 3, kind: output, shape index: {}]  }
   0x1   :  { %v146_v0 = vld [vmem:[%s220_s1 + $0x8] sm:$0xff]   ;;  %133 = vmatprep.subr.bf16.mxu0 %v170_v1  ;;  %v147_v2 = vld [vmem:[%s220_s1] sm:$0xff]   ;;  %137 = vmatprep.mubr.msk.bf16.mxu0 %vm171_vm0, %v170_v1 }
   0x2   :  { %134 = vmatpush3.bf16.msra.mxu0 %v146_v0  ;;  %v25_v3 = vld [vmem:[%s219_s0] sm:$0xff]  ;;  %v26_v4 = vld [vmem:[%s219_s0 + $0x8] sm:$0xff] }
   0x3   :  { %8 = vsyncpa [#allocation4], 0  ;;  %135 = vmatprep.subr.bf16.mxu0 %v170_v1  ;;  %21 = vst.msk [vmem:[#allocation2] sm:$0xff] %vm20_vm1, %v170_v1  ;;  %v27_v5 = vpack.c.bf16 %v26_v4, %v25_v3  ;;  %vm44_vm2 = vcmask 261120   ;;  %v129_v14 = vld [vmem:[%s221_s2] ss:$0 sm:$0xff] }
   0x4   :  { %22 = vst.msk [vmem:[#allocation2 + $0x8] sm:$0xff] %vm20_vm1, %v170_v1  ;;  %s172_s20 = smov [#allocation3]  }
   0x5   :  { %s115_s21 = sshll.u32 %s172_s20, 4  ;;  %s116_s21 = int_to_ptr.vmem [resolvable:$true] %s115_s21 }
   0x6   :  { %136 = vmatpush3.bf16.msra.mxu0 %v147_v2  ;;  %s148_s22 = scalar_lea.vmem %s116_s21, 256  ;;  %p153_p1 = scmp.lt.s32.totalorder %s116_s21, %s116_s21 }
   0x7   :  { %p149_p0 = scmp.ne.s32.totalorder %s116_s21, %s148_s22  ;;  %p154_p2 = scmp.lt.s32.totalorder %s148_s22, %s148_s22 }
   0x9   :  { %138 = vmatmul.mubr.msk.bf16.vlgmr.msra.gmra.mxu0 %vm44_vm2, %v27_v5  ;;  %p155_p3 = por %p154_p2, %p153_p1 }
   0xa   :  { %v23_v6 = vld [vmem:[#allocation2] sm:$0xff] }
   0xb   :  { %v24_v10 = vld [vmem:[#allocation2 + $0x8] sm:$0xff]  ;;  %p156_p4 = pnand %p155_p3, %p149_p0 }
  0xc9   :  { %v82_v7 = vpop.f32.mrf.mxu0 }
  0xca   :  { %v89_v8 = vadd.f32 %v82_v7, %v23_v6 }
  0xcb   :  { %v139_v9 = vpop.f32.mrf.mxu0 }
  0xcc   :  { %92 = vst.msk [vmem:[#allocation2] sm:$0xff] %vm20_vm1, %v89_v8 }
  0xcd   :  { %v85_v11 = vpop.f32.mrf.mxu0 }
  0xce   :  { %v90_v12 = vadd.f32 %v85_v11, %v24_v10 }
  0xcf   :  { %v140_v13 = vpop.f32.mrf.mxu0 }
  0xd0   :  { %93 = vst.msk [vmem:[#allocation2 + $0x8] sm:$0xff] %vm20_vm1, %v90_v12 }
  0xd3   :  { %v97_v15 = vld [vmem:[#allocation2] sm:$0xff] }
  0xd4   :  { %v106_v16 = vadd.f32 %v129_v14, %v97_v15 }
  0xd6   :  { %108 = vst.msk [vmem:[#allocation3] sm:$0xff] %vm20_vm1, %v106_v16 }
  0xd7   :  { %v98_v17 = vld [vmem:[#allocation2 + $0x8] sm:$0xff] }
  0xd8   :  { %v107_v18 = vadd.f32 %v129_v14, %v98_v17 }
  0xda   :  { %109 = vst.msk [vmem:[#allocation3 + $0x8] sm:$0xff] %vm20_vm1, %v107_v18 }
  0xdb   :  { %159 = shalt.err (!%p156_p4)
}
  0xdc   :  { %s173_s23 = smov 128   ;;  %s174_s2 = smov 8  }
  0xdd   :  { %121 = dma.vmem_to_hbm [thread:$0]  %s116_s21, 256, %s222_s3, [#allocation4], %s173_s23, %s173_s23, %s174_s2  }
  0xde   :  { %168 = dma.done.wait [#allocation4], 256  }
  0xdf   :  { %169 = vsyncadd [#allocation4], 4294967040 }
  0xe0   :  { %125 = vsyncpa [#allocation4], 1 }

// kernel: decoder_forward.18
= control target key start
LH: loop header
LB: loop body
LE: loop exit
PB: predicated region body
PF: predicated region fallthrough
CT: control target
= control target key end

     0   :  { %vm28_vm0 = vcmask 261120   ;;  %v228_v0 = vmov 0.0   ;;  %vm229_vm1 = vmmov 0   ;;  %vm72_vm2 = vcmask 523264   ;;  %s311_s1 = inlined_call_operand.vmem [shape: bf16[64,32], index: 1, kind: input, shape index: {}]   ;;  %s312_s0 = inlined_call_operand.vmem [shape: bf16[16,64], index: 0, kind: input, shape index: {}]   ;;  %s313_s2 = inlined_call_operand.vmem [shape: f32[1,32], index: 2, kind: input, shape index: {}]   ;;  %s314_s3 = inlined_call_operand.vmem [shape: f32[16,32], index: 3, kind: input, shape index: {}]   ;;  %s315_s4 = inlined_call_operand.vmem [shape: f32[1,32], index: 4, kind: input, shape index: {}]   ;;  %s316_s5 = inlined_call_operand.vmem [shape: f32[1,32], index: 5, kind: input, shape index: {}]   ;;  %s317_s6 = inlined_call_operand.vmem [shape: f32[16,32], index: 6, kind: output, shape index: {}]  }
   0x1   :  { %205 = vmatprep.subr.bf16.mxu0 %v228_v0  ;;  %v219_v1 = vld [vmem:[%s311_s1 + $0x18] sm:$0xff]   ;;  %213 = vmatprep.mubr.msk.bf16.mxu0 %vm229_vm1, %v228_v0  ;;  %29 = vst.msk [vmem:[#allocation2] sm:$0xff] %vm28_vm0, %v228_v0  ;;  %30 = vst.msk [vmem:[#allocation2 + $0x8] sm:$0xff] %vm28_vm0, %v228_v0  ;;  %v220_v2 = vld [vmem:[%s311_s1 + $0x10] sm:$0xff]  }
   0x2   :  { %206 = vmatpush3.bf16.msra.mxu0 %v219_v1  ;;  %v221_v3 = vld [vmem:[%s311_s1 + $0x8] sm:$0xff]   ;;  %v222_v4 = vld [vmem:[%s311_s1] sm:$0xff]  }
   0x3   :  { %207 = vmatprep.subr.bf16.mxu0 %v228_v0  ;;  %v223_v5 = vld [vmem:[%s312_s0] sm:$0xff]   ;;  %v137_v20 = vld [vmem:[%s314_s3 + $0x8] sm:$0xff] }
   0x4   :  { %v197_v14 = vld [vmem:[%s313_s2] ss:$0 sm:$0xff] }
   0x5   :  { %v136_v16 = vld [vmem:[%s314_s3] sm:$0xff] }
   0x6   :  { %208 = vmatpush3.bf16.msra.mxu0 %v220_v2  ;;  %v198_v42 = vld [vmem:[%s315_s4] ss:$0 sm:$0xff] }
   0x7   :  { %209 = vmatprep.subr.bf16.mxu0 %v228_v0  ;;  %v199_v44 = vld [vmem:[%s316_s5] ss:$0 sm:$0xff] }
   0x8   :  { %v31_v6 = vld [vmem:[#allocation2] sm:$0xff]  ;;  %v32_v10 = vld [vmem:[#allocation2 + $0x8] sm:$0xff] }
   0xa   :  { %210 = vmatpush3.bf16.msra.mxu0 %v221_v3 }
   0xb   :  { %211 = vmatprep.subr.bf16.mxu0 %v228_v0 }
   0xe   :  { %212 = vmatpush3.bf16.msra.mxu0 %v222_v4 }
  0x11   :  { %214 = vmatmul.mubr.msk.bf16.vlgmr.msra.gmra.mxu0 %vm72_vm2, %v223_v5 }
  0xd1   :  { %v110_v7 = vpop.f32.mrf.mxu0 }
  0xd2   :  { %v117_v8 = vadd.f32 %v110_v7, %v31_v6 }
  0xd3   :  { %v215_v9 = vpop.f32.mrf.mxu0 }
  0xd4   :  { %120 = vst.msk [vmem:[#allocation2] sm:$0xff] %vm28_vm0, %v117_v8 }
  0xd5   :  { %v113_v11 = vpop.f32.mrf.mxu0 }
  0xd6   :  { %v118_v12 = vadd.f32 %v113_v11, %v32_v10 }
  0xd7   :  { %v216_v13 = vpop.f32.mrf.mxu0 }
  0xd8   :  { %121 = vst.msk [vmem:[#allocation2 + $0x8] sm:$0xff] %vm28_vm0, %v118_v12 }
  0xdb   :  { %v125_v15 = vld [vmem:[#allocation2] sm:$0xff] }
  0xdc   :  { %v134_v17 = vadd.f32 %v197_v14, %v125_v15 }
  0xde   :  { %v138_v18 = vadd.f32 %v136_v16, %v134_v17 }
  0xdf   :  { %v126_v19 = vld [vmem:[#allocation2 + $0x8] sm:$0xff] }
  0xe0   :  { %v140_v21 = vsel %vm28_vm0, %v138_v18, 0.0  ;;  %v135_v22 = vadd.f32 %v197_v14, %v126_v19 }
  0xe1   :  { %141 = vadd.xlane.f32.xlu0 %v140_v21 }
  0xe2   :  { %v139_v23 = vadd.f32 %v137_v20, %v135_v22 }
  0xe4   :  { %v143_v24 = vsel %vm28_vm0, %v139_v23, 0.0 }
  0xe5   :  { %144 = vadd.xlane.f32.xlu0 %v143_v24 }
 0x16a   :  { %v142_v25 = vpop.xlane.xlu0 %141 }
 0x16b   :  { %v147_v26 = vmul.f32 0.03125, %v142_v25 }
 0x16d   :  { %v149_v27 = vsub.f32 %v138_v18, %v147_v26 }
 0x16e   :  { %v145_v28 = vpop.xlane.xlu0 %144 }
 0x16f   :  { %v148_v29 = vmul.f32 0.03125, %v145_v28  ;;  %v151_v30 = vmul.f32 %v149_v27, %v149_v27 }
 0x171   :  { %v150_v31 = vsub.f32 %v139_v23, %v148_v29  ;;  %v153_v32 = vsel %vm28_vm0, %v151_v30, 0.0 }
 0x172   :  { %154 = vadd.xlane.f32.xlu1 %v153_v32 }
 0x173   :  { %v152_v33 = vmul.f32 %v150_v31, %v150_v31 }
 0x175   :  { %v156_v34 = vsel %vm28_vm0, %v152_v33, 0.0 }
 0x176   :  { %157 = vadd.xlane.f32.xlu1 %v156_v34 }
 0x1fb   :  { %v155_v35 = vpop.xlane.xlu1 %154 }
 0x1fc   :  { %v159_v36 = vmul.f32 0.03125, %v155_v35 }
 0x1fe   :  { %v161_v37 = vadd.f32 1e-12, %v159_v36 }
 0x1ff   :  { %v158_v38 = vpop.xlane.xlu1 %157 }
 0x200   :  { %224 = vrsqrt.f32 %v161_v37  ;;  %v160_v39 = vmul.f32 0.03125, %v158_v38 }
 0x202   :  { %v162_v40 = vadd.f32 1e-12, %v160_v39 }
 0x204   :  { %226 = vrsqrt.f32 %v162_v40 }
 0x20d   :  { %v225_v41 = vpop.eup %224 }
 0x20e   :  { %v165_v43 = vmul.f32 %v225_v41, %v149_v27 }
 0x210   :  { %v174_v45 = vmul.f32 %v198_v42, %v165_v43 }
 0x211   :  { %v227_v46 = vpop.eup %226 }
 0x212   :  { %v183_v47 = vadd.f32 %v199_v44, %v174_v45  ;;  %v166_v48 = vmul.f32 %v227_v46, %v150_v31 }
 0x214   :  { %185 = vst.msk [vmem:[%s317_s6] sm:$0xff] %vm28_vm0, %v183_v47  ;;  %v175_v49 = vmul.f32 %v198_v42, %v166_v48 }
 0x216   :  { %v184_v50 = vadd.f32 %v199_v44, %v175_v49 }
 0x218   :  { %186 = vst.msk [vmem:[%s317_s6 + $0x8] sm:$0xff] %vm28_vm0, %v184_v50 }

</bundles_post_ra>
